<compile_context>
chip_gen: v7x
topology: tpu7x:2x2x1
jax: 0.10.0
libtpu: 0.0.40
codegen_flags: <defaults>
</compile_context>

<pallas_src>
import functools

import jax
import jax.numpy as jnp
from jax import lax
from jax.experimental import pallas as pl
from jax.experimental.pallas import tpu as pltpu

LANE = 128  # TPU lane-tile width; each GRU gate chunk (r|z|n) gets its own lane tile.


def ggnn_kernel(x_ref, a_ref, wf_ref, whh_ref, bih_ref, bhh_ref, gw_ref, gb_ref,
                out_ref, *, num_layers):
    x = x_ref[...]                       # [N, Dp]  node states (lanes D..Dp-1 are zero)
    A = a_ref[...]                       # [N, N]   dense weighted adjacency (A[dst, src])
    N, Dp = x.shape
    TD = 3 * Dp

    # ---- hoisted loop-invariant loads / broadcasts (JAX does not CSE broadcast_in_dim) ----
    whh = whh_ref[...]                                    # [Dp, 3Dp] hidden->gates (r|z|n)
    bih = jnp.broadcast_to(bih_ref[...], (N, TD))         # [N, 3Dp]
    bhh = jnp.broadcast_to(bhh_ref[...], (N, TD))         # [N, 3Dp]

    for layer in range(num_layers):      # static unroll (L=4: tiny vreg working set)
        # Critical path per layer = 2 dependent MXU matmuls: A@x, then (A@x)@Wfused[l]
        # (Wfused[l] = W[l] @ Wih^T pre-fused in the glue). gh only depends on x and
        # pipelines in parallel with that chain.
        ax = jnp.dot(A, x, preferred_element_type=jnp.float32)                 # [N, Dp]
        gh = jnp.dot(x, whh, preferred_element_type=jnp.float32) + bhh         # [N, 3Dp]
        gi = jnp.dot(ax, wf_ref[layer], preferred_element_type=jnp.float32) + bih

        # GRUCell (PyTorch chunk order r|z|n). All slices below are 128-lane-tile
        # aligned views (gate chunks were padded to their own tiles in the glue).
        rz = jax.nn.sigmoid(gi[:, :2 * Dp] + gh[:, :2 * Dp])                   # [N, 2Dp]
        z = rz[:, Dp:]
        n = jnp.tanh(gi[:, 2 * Dp:] + rz[:, :Dp] * gh[:, 2 * Dp:])
        x = n + z * (x - n)              # == (1 - z) * n + z * x, one fewer VPU mul

    # GlobalAttention pooling over a single graph (batch == all zeros):
    #   gate = softmax_nodes(sigmoid(Linear(x)));  out = sum_n gate * x
    # sigmoid output is in (0,1) so the usual max-subtraction before exp is unnecessary.
    gate = jnp.dot(x, gw_ref[...], preferred_element_type=jnp.float32) + gb_ref[0, 0]
    e = jnp.exp(jax.nn.sigmoid(gate))                     # [N, 1]
    s = jnp.sum(e, axis=0, keepdims=True)                 # [1, 1]
    inv = pl.reciprocal(s, approx=True)
    inv = inv * (2.0 - s * inv)                           # one Newton step -> ~f32 accuracy
    # Weighted node sum as a tiny MXU dot (contract over the node axis).
    pooled = lax.dot_general(e, x, (((0,), (0,)), ((), ())),
                             preferred_element_type=jnp.float32)               # [1, Dp]
    out_ref[...] = pooled * inv


def run_ggnn(x0p, A, wfused, whh_pad, bih_row, bhh_row, gate_w_pad, gate_b, num_layers):
    G, N, Dp = x0p.shape
    L = wfused.shape[0]
    TD = 3 * Dp
    kernel = functools.partial(ggnn_kernel, num_layers=num_layers)
    return pl.pallas_call(
        kernel,
        out_shape=jax.ShapeDtypeStruct((G, 1, Dp), jnp.float32),
        grid_spec=pltpu.PrefetchScalarGridSpec(
            num_scalar_prefetch=0,
            grid=(G,),                                                  # one graph per step
            in_specs=[
                pl.BlockSpec((None, N, Dp), lambda g: (g, 0, 0)),       # x      (per graph)
                pl.BlockSpec((None, N, N), lambda g: (g, 0, 0)),        # A      (per graph)
                pl.BlockSpec((L, Dp, TD), lambda g: (0, 0, 0)),         # W[l] @ Wih^T fused
                pl.BlockSpec((Dp, TD), lambda g: (0, 0)),               # Whh^T  (padded)
                pl.BlockSpec((1, TD), lambda g: (0, 0)),                # bias_ih
                pl.BlockSpec((1, TD), lambda g: (0, 0)),                # bias_hh
                pl.BlockSpec((Dp, 1), lambda g: (0, 0)),                # gate weight
                pl.BlockSpec(memory_space=pltpu.MemorySpace.SMEM),      # gate bias (scalar)
            ],
            out_specs=pl.BlockSpec((None, 1, Dp), lambda g: (g, 0, 0)),  # lane-dense slab
        ),
        compiler_params=pltpu.CompilerParams(
            dimension_semantics=("parallel",)),   # v7x: graphs sharded across both TCs
    )(x0p, A, wfused, whh_pad, bih_row, bhh_row, gate_w_pad, gate_b)


if __name__ == "__main__":
    key = jax.random.PRNGKey(0)
    vocablen = 100
    D = 32            # embedding_dim
    num_layers = 4
    N = 16            # nodes per graph
    E = 40            # edges per graph
    G = 4             # graphs batched per pallas_call (parallel grid axis)
    Dp = LANE

    ks = jax.random.split(key, 12)
    # deterministic synthetic parameters (shapes from the module's __init__)
    tok_emb   = jax.random.normal(ks[0], (vocablen + 2, D), jnp.float32) * 0.1   # token_embedding
    edge_emb  = jax.random.normal(ks[1], (7, D), jnp.float32) * 0.1              # nn.Embedding(7, D)
    W         = jax.random.normal(ks[2], (num_layers, D, D), jnp.float32) / jnp.sqrt(D)  # GatedGraphConv.weight
    weight_ih = jax.random.normal(ks[3], (3 * D, D), jnp.float32) / jnp.sqrt(D)  # GRUCell
    weight_hh = jax.random.normal(ks[4], (3 * D, D), jnp.float32) / jnp.sqrt(D)
    bias_ih   = jax.random.normal(ks[5], (3 * D,), jnp.float32) * 0.1
    bias_hh   = jax.random.normal(ks[6], (3 * D,), jnp.float32) * 0.1
    gate_w    = jax.random.normal(ks[7], (D, 1), jnp.float32) / jnp.sqrt(D)      # mlp_gate Linear(D, 1)
    gate_b    = jax.random.normal(ks[8], (1, 1), jnp.float32) * 0.1

    # synthetic graph batch (node_ids, edges [2,E], edge_types in [1,7] per graph)
    node_ids   = jax.random.randint(ks[9], (G, N), 0, vocablen)
    edges      = jax.random.randint(ks[10], (G, 2, E), 0, N)
    edge_types = jax.random.randint(ks[11], (G, E), 1, 8)

    # ---- glue (plain JAX): embedding lookups + dense adjacency build ----
    # TODO(synk): the data-dependent edge scatter-add has no clean Pallas equivalent at this
    # size; it is densified into per-graph A so the kernel does a dense MXU matmul instead.
    x0 = tok_emb[node_ids + 1]                           # embed(node_ids + 1)        [G, N, D]
    edge_weight = edge_emb[edge_types - 1].mean(-1)      # edge_embed(attr-1).mean(1) [G, E]
    src, dst = edges[:, 0, :], edges[:, 1, :]
    gidx = jnp.arange(G)[:, None]
    A = jnp.zeros((G, N, N), jnp.float32).at[gidx, dst, src].add(edge_weight)

    # ---- pack weights for the kernel ----
    # Pre-fuse the per-layer projection into the GRU input path (matrix associativity):
    #   gi = (A @ (x @ W[l])) @ Wih^T == (A @ x) @ (W[l] @ Wih^T)
    wih_t = weight_ih.T                                  # [D, 3D]
    whh_t = weight_hh.T                                  # [D, 3D]
    wfused = jnp.einsum("lde,ef->ldf", W, wih_t)         # [L, D, 3D]

    def pad_gate_cols(m):   # [..., 3D] -> [..., 3*Dp]: each gate chunk in its own lane tile
        out = jnp.zeros(m.shape[:-1] + (3 * Dp,), jnp.float32)
        for g in range(3):
            out = out.at[..., g * Dp:g * Dp + D].set(m[..., g * D:(g + 1) * D])
        return out

    def pad_rows(m):        # pad the contraction axis (second-to-last) from D to Dp with zeros
        out = jnp.zeros(m.shape[:-2] + (Dp, m.shape[-1]), jnp.float32)
        return out.at[..., :D, :].set(m)

    wfused_pad = pad_rows(pad_gate_cols(wfused))              # [L, Dp, 3Dp]
    whh_pad    = pad_rows(pad_gate_cols(whh_t))               # [Dp, 3Dp]
    bih_pad    = pad_gate_cols(bias_ih.reshape(1, 3 * D))     # [1, 3Dp]
    bhh_pad    = pad_gate_cols(bias_hh.reshape(1, 3 * D))     # [1, 3Dp]
    gate_w_pad = pad_rows(gate_w)                             # [Dp, 1]
    x0_pad = jnp.zeros((G, N, Dp), jnp.float32).at[..., :D].set(x0)   # [G, N, Dp]

    out = run_ggnn(x0_pad, A, wfused_pad, whh_pad, bih_pad, bhh_pad,
                   gate_w_pad, gate_b, num_layers)
    out = jax.block_until_ready(out)
    out = out[:, 0, :D]                                       # [G, D]  strip lane padding

    # ---- pure-JAX reference (mirrors PyG GatedGraphConv + GlobalAttention, per graph) ----
    def ref_one(xg, Ag):
        x = xg
        for l in range(num_layers):
            m = x @ W[l]
            m = Ag @ m
            gi = m @ weight_ih.T + bias_ih
            gh = x @ weight_hh.T + bias_hh
            i_r, i_z, i_n = jnp.split(gi, 3, axis=1)
            h_r, h_z, h_n = jnp.split(gh, 3, axis=1)
            r = jax.nn.sigmoid(i_r + h_r)
            z = jax.nn.sigmoid(i_z + h_z)
            n = jnp.tanh(i_n + r * h_n)
            x = (1.0 - z) * n + z * x
        gate = jax.nn.sigmoid(x @ gate_w + gate_b)
        gate = jax.nn.softmax(gate, axis=0)
        return jnp.sum(gate * x, axis=0, keepdims=True)        # hg.view(-1, embedding_dim)

    for g in range(G):
        ref_g = ref_one(x0[g], A[g])
        assert ref_g.shape == (1, D), ref_g.shape
        got = out[g:g + 1]
        assert jnp.allclose(got, ref_g, rtol=1e-4, atol=1e-4), (
            g, float(jnp.max(jnp.abs(got - ref_g))))
    print("KERNEL_OK")
</pallas_src>

<mosaic_0001>
module attributes {stable_mosaic.version = 11 : i64} {
  func.func @ggnn_kernel(%arg0: i32, %arg1: memref<1x16x128xf32, #tpu.memory_space<vmem>>, %arg2: memref<1x16x16xf32, #tpu.memory_space<vmem>>, %arg3: memref<4x128x384xf32, #tpu.memory_space<vmem>>, %arg4: memref<128x384xf32, #tpu.memory_space<vmem>>, %arg5: memref<1x384xf32, #tpu.memory_space<vmem>>, %arg6: memref<1x384xf32, #tpu.memory_space<vmem>>, %arg7: memref<128x1xf32, #tpu.memory_space<vmem>>, %arg8: memref<1x1xf32, #tpu.memory_space<smem>>, %arg9: memref<1x1x128xf32, #tpu.memory_space<vmem>>) attributes {dimension_semantics = [#tpu.dimension_semantics<parallel>], iteration_bounds = array<i64: 4>, scalar_prefetch = 0 : i64, scratch_operands = 0 : i64, tpu.core_type = #tpu.core_type<tc>, window_params = [{transform_indices = @transform_0, window_bounds = array<i64: 1, 16, 128>}, {transform_indices = @transform_1, window_bounds = array<i64: 1, 16, 16>}, {pipeline_mode = #tpu.pipeline_mode<synchronous>, transform_indices = @transform_2, window_bounds = array<i64: 4, 128, 384>}, {pipeline_mode = #tpu.pipeline_mode<synchronous>, transform_indices = @transform_3, window_bounds = array<i64: 128, 384>}, {pipeline_mode = #tpu.pipeline_mode<synchronous>, transform_indices = @transform_4, window_bounds = array<i64: 1, 384>}, {pipeline_mode = #tpu.pipeline_mode<synchronous>, transform_indices = @transform_5, window_bounds = array<i64: 1, 384>}, {pipeline_mode = #tpu.pipeline_mode<synchronous>, transform_indices = @transform_6, window_bounds = array<i64: 128, 1>}, {transform_indices = @transform_7, window_bounds = array<i64: 1, 1>}, {transform_indices = @transform_8, window_bounds = array<i64: 1, 1, 128>}]} {
    %c0 = arith.constant 0 : index
    %c0_0 = arith.constant 0 : index
    %c0_1 = arith.constant 0 : index
    %0 = vector.load %arg1[%c0, %c0_0, %c0_1] : memref<1x16x128xf32, #tpu.memory_space<vmem>>, vector<1x16x128xf32>
    %1 = vector.shape_cast %0 : vector<1x16x128xf32> to vector<16x128xf32>
    %c0_2 = arith.constant 0 : index
    %c0_3 = arith.constant 0 : index
    %c0_4 = arith.constant 0 : index
    %2 = vector.load %arg2[%c0_2, %c0_3, %c0_4] : memref<1x16x16xf32, #tpu.memory_space<vmem>>, vector<1x16x16xf32>
    %3 = vector.shape_cast %2 : vector<1x16x16xf32> to vector<16x16xf32>
    %c0_5 = arith.constant 0 : index
    %c0_6 = arith.constant 0 : index
    %4 = vector.load %arg4[%c0_5, %c0_6] : memref<128x384xf32, #tpu.memory_space<vmem>>, vector<128x384xf32>
    %c0_7 = arith.constant 0 : index
    %c0_8 = arith.constant 0 : index
    %5 = vector.load %arg5[%c0_7, %c0_8] : memref<1x384xf32, #tpu.memory_space<vmem>>, vector<1x384xf32>
    %6 = vector.shape_cast %5 : vector<1x384xf32> to vector<1x384xf32>
    %7 = vector.broadcast %6 : vector<1x384xf32> to vector<16x384xf32>
    %c0_9 = arith.constant 0 : index
    %c0_10 = arith.constant 0 : index
    %8 = vector.load %arg6[%c0_9, %c0_10] : memref<1x384xf32, #tpu.memory_space<vmem>>, vector<1x384xf32>
    %9 = vector.shape_cast %8 : vector<1x384xf32> to vector<1x384xf32>
    %10 = vector.broadcast %9 : vector<1x384xf32> to vector<16x384xf32>
    %cst = arith.constant dense<0.000000e+00> : vector<16x128xf32>
    %11 = tpu.matmul %3, %1, %cst {dimension_numbers = #tpu.dot_dimension_numbers<[1], [0], [0], [1], [0, 0, 1, 1], [], []>} : vector<16x16xf32>, vector<16x128xf32>, vector<16x128xf32> -> vector<16x128xf32>
    %cst_11 = arith.constant dense<0.000000e+00> : vector<16x384xf32>
    %12 = tpu.matmul %1, %4, %cst_11 {dimension_numbers = #tpu.dot_dimension_numbers<[1], [0], [0], [1], [0, 0, 1, 1], [], []>} : vector<16x128xf32>, vector<128x384xf32>, vector<16x384xf32> -> vector<16x384xf32>
    %13 = arith.addf %12, %10 : vector<16x384xf32>
    %c0_12 = arith.constant 0 : index
    %c0_13 = arith.constant 0 : index
    %c0_14 = arith.constant 0 : index
    %14 = vector.load %arg3[%c0_12, %c0_13, %c0_14] : memref<4x128x384xf32, #tpu.memory_space<vmem>>, vector<1x128x384xf32>
    %15 = vector.shape_cast %14 : vector<1x128x384xf32> to vector<128x384xf32>
    %cst_15 = arith.constant dense<0.000000e+00> : vector<16x384xf32>
    %16 = tpu.matmul %11, %15, %cst_15 {dimension_numbers = #tpu.dot_dimension_numbers<[1], [0], [0], [1], [0, 0, 1, 1], [], []>} : vector<16x128xf32>, vector<128x384xf32>, vector<16x384xf32> -> vector<16x384xf32>
    %17 = arith.addf %16, %7 : vector<16x384xf32>
    %18 = vector.extract_strided_slice %17 {offsets = [0, 0], sizes = [16, 256], strides = [1, 1]} : vector<16x384xf32> to vector<16x256xf32>
    %19 = vector.extract_strided_slice %13 {offsets = [0, 0], sizes = [16, 256], strides = [1, 1]} : vector<16x384xf32> to vector<16x256xf32>
    %20 = arith.addf %18, %19 : vector<16x256xf32>
    %21 = arith.negf %20 : vector<16x256xf32>
    %22 = math.exp %21 : vector<16x256xf32>
    %cst_16 = arith.constant 1.000000e+00 : f32
    %23 = vector.broadcast %cst_16 : f32 to vector<16x256xf32>
    %24 = arith.addf %23, %22 : vector<16x256xf32>
    %25 = arith.divf %23, %24 : vector<16x256xf32>
    %26 = vector.extract_strided_slice %25 {offsets = [0, 128], sizes = [16, 128], strides = [1, 1]} : vector<16x256xf32> to vector<16x128xf32>
    %27 = vector.extract_strided_slice %17 {offsets = [0, 256], sizes = [16, 128], strides = [1, 1]} : vector<16x384xf32> to vector<16x128xf32>
    %28 = vector.extract_strided_slice %25 {offsets = [0, 0], sizes = [16, 128], strides = [1, 1]} : vector<16x256xf32> to vector<16x128xf32>
    %29 = vector.extract_strided_slice %13 {offsets = [0, 256], sizes = [16, 128], strides = [1, 1]} : vector<16x384xf32> to vector<16x128xf32>
    %30 = arith.mulf %28, %29 : vector<16x128xf32>
    %31 = arith.addf %27, %30 : vector<16x128xf32>
    %32 = math.tanh %31 : vector<16x128xf32>
    %33 = arith.subf %1, %32 : vector<16x128xf32>
    %34 = arith.mulf %26, %33 : vector<16x128xf32>
    %35 = arith.addf %32, %34 : vector<16x128xf32>
    %cst_17 = arith.constant dense<0.000000e+00> : vector<16x128xf32>
    %36 = tpu.matmul %3, %35, %cst_17 {dimension_numbers = #tpu.dot_dimension_numbers<[1], [0], [0], [1], [0, 0, 1, 1], [], []>} : vector<16x16xf32>, vector<16x128xf32>, vector<16x128xf32> -> vector<16x128xf32>
    %cst_18 = arith.constant dense<0.000000e+00> : vector<16x384xf32>
    %37 = tpu.matmul %35, %4, %cst_18 {dimension_numbers = #tpu.dot_dimension_numbers<[1], [0], [0], [1], [0, 0, 1, 1], [], []>} : vector<16x128xf32>, vector<128x384xf32>, vector<16x384xf32> -> vector<16x384xf32>
    %38 = arith.addf %37, %10 : vector<16x384xf32>
    %c1 = arith.constant 1 : index
    %c0_19 = arith.constant 0 : index
    %c0_20 = arith.constant 0 : index
    %39 = vector.load %arg3[%c1, %c0_19, %c0_20] : memref<4x128x384xf32, #tpu.memory_space<vmem>>, vector<1x128x384xf32>
    %40 = vector.shape_cast %39 : vector<1x128x384xf32> to vector<128x384xf32>
    %cst_21 = arith.constant dense<0.000000e+00> : vector<16x384xf32>
    %41 = tpu.matmul %36, %40, %cst_21 {dimension_numbers = #tpu.dot_dimension_numbers<[1], [0], [0], [1], [0, 0, 1, 1], [], []>} : vector<16x128xf32>, vector<128x384xf32>, vector<16x384xf32> -> vector<16x384xf32>
    %42 = arith.addf %41, %7 : vector<16x384xf32>
    %43 = vector.extract_strided_slice %42 {offsets = [0, 0], sizes = [16, 256], strides = [1, 1]} : vector<16x384xf32> to vector<16x256xf32>
    %44 = vector.extract_strided_slice %38 {offsets = [0, 0], sizes = [16, 256], strides = [1, 1]} : vector<16x384xf32> to vector<16x256xf32>
    %45 = arith.addf %43, %44 : vector<16x256xf32>
    %46 = arith.negf %45 : vector<16x256xf32>
    %47 = math.exp %46 : vector<16x256xf32>
    %cst_22 = arith.constant 1.000000e+00 : f32
    %48 = vector.broadcast %cst_22 : f32 to vector<16x256xf32>
    %49 = arith.addf %48, %47 : vector<16x256xf32>
    %50 = arith.divf %48, %49 : vector<16x256xf32>
    %51 = vector.extract_strided_slice %50 {offsets = [0, 128], sizes = [16, 128], strides = [1, 1]} : vector<16x256xf32> to vector<16x128xf32>
    %52 = vector.extract_strided_slice %42 {offsets = [0, 256], sizes = [16, 128], strides = [1, 1]} : vector<16x384xf32> to vector<16x128xf32>
    %53 = vector.extract_strided_slice %50 {offsets = [0, 0], sizes = [16, 128], strides = [1, 1]} : vector<16x256xf32> to vector<16x128xf32>
    %54 = vector.extract_strided_slice %38 {offsets = [0, 256], sizes = [16, 128], strides = [1, 1]} : vector<16x384xf32> to vector<16x128xf32>
    %55 = arith.mulf %53, %54 : vector<16x128xf32>
    %56 = arith.addf %52, %55 : vector<16x128xf32>
    %57 = math.tanh %56 : vector<16x128xf32>
    %58 = arith.subf %35, %57 : vector<16x128xf32>
    %59 = arith.mulf %51, %58 : vector<16x128xf32>
    %60 = arith.addf %57, %59 : vector<16x128xf32>
    %cst_23 = arith.constant dense<0.000000e+00> : vector<16x128xf32>
    %61 = tpu.matmul %3, %60, %cst_23 {dimension_numbers = #tpu.dot_dimension_numbers<[1], [0], [0], [1], [0, 0, 1, 1], [], []>} : vector<16x16xf32>, vector<16x128xf32>, vector<16x128xf32> -> vector<16x128xf32>
    %cst_24 = arith.constant dense<0.000000e+00> : vector<16x384xf32>
    %62 = tpu.matmul %60, %4, %cst_24 {dimension_numbers = #tpu.dot_dimension_numbers<[1], [0], [0], [1], [0, 0, 1, 1], [], []>} : vector<16x128xf32>, vector<128x384xf32>, vector<16x384xf32> -> vector<16x384xf32>
    %63 = arith.addf %62, %10 : vector<16x384xf32>
    %c2 = arith.constant 2 : index
    %c0_25 = arith.constant 0 : index
    %c0_26 = arith.constant 0 : index
    %64 = vector.load %arg3[%c2, %c0_25, %c0_26] : memref<4x128x384xf32, #tpu.memory_space<vmem>>, vector<1x128x384xf32>
    %65 = vector.shape_cast %64 : vector<1x128x384xf32> to vector<128x384xf32>
    %cst_27 = arith.constant dense<0.000000e+00> : vector<16x384xf32>
    %66 = tpu.matmul %61, %65, %cst_27 {dimension_numbers = #tpu.dot_dimension_numbers<[1], [0], [0], [1], [0, 0, 1, 1], [], []>} : vector<16x128xf32>, vector<128x384xf32>, vector<16x384xf32> -> vector<16x384xf32>
    %67 = arith.addf %66, %7 : vector<16x384xf32>
    %68 = vector.extract_strided_slice %67 {offsets = [0, 0], sizes = [16, 256], strides = [1, 1]} : vector<16x384xf32> to vector<16x256xf32>
    %69 = vector.extract_strided_slice %63 {offsets = [0, 0], sizes = [16, 256], strides = [1, 1]} : vector<16x384xf32> to vector<16x256xf32>
    %70 = arith.addf %68, %69 : vector<16x256xf32>
    %71 = arith.negf %70 : vector<16x256xf32>
    %72 = math.exp %71 : vector<16x256xf32>
    %cst_28 = arith.constant 1.000000e+00 : f32
    %73 = vector.broadcast %cst_28 : f32 to vector<16x256xf32>
    %74 = arith.addf %73, %72 : vector<16x256xf32>
    %75 = arith.divf %73, %74 : vector<16x256xf32>
    %76 = vector.extract_strided_slice %75 {offsets = [0, 128], sizes = [16, 128], strides = [1, 1]} : vector<16x256xf32> to vector<16x128xf32>
    %77 = vector.extract_strided_slice %67 {offsets = [0, 256], sizes = [16, 128], strides = [1, 1]} : vector<16x384xf32> to vector<16x128xf32>
    %78 = vector.extract_strided_slice %75 {offsets = [0, 0], sizes = [16, 128], strides = [1, 1]} : vector<16x256xf32> to vector<16x128xf32>
    %79 = vector.extract_strided_slice %63 {offsets = [0, 256], sizes = [16, 128], strides = [1, 1]} : vector<16x384xf32> to vector<16x128xf32>
    %80 = arith.mulf %78, %79 : vector<16x128xf32>
    %81 = arith.addf %77, %80 : vector<16x128xf32>
    %82 = math.tanh %81 : vector<16x128xf32>
    %83 = arith.subf %60, %82 : vector<16x128xf32>
    %84 = arith.mulf %76, %83 : vector<16x128xf32>
    %85 = arith.addf %82, %84 : vector<16x128xf32>
    %cst_29 = arith.constant dense<0.000000e+00> : vector<16x128xf32>
    %86 = tpu.matmul %3, %85, %cst_29 {dimension_numbers = #tpu.dot_dimension_numbers<[1], [0], [0], [1], [0, 0, 1, 1], [], []>} : vector<16x16xf32>, vector<16x128xf32>, vector<16x128xf32> -> vector<16x128xf32>
    %cst_30 = arith.constant dense<0.000000e+00> : vector<16x384xf32>
    %87 = tpu.matmul %85, %4, %cst_30 {dimension_numbers = #tpu.dot_dimension_numbers<[1], [0], [0], [1], [0, 0, 1, 1], [], []>} : vector<16x128xf32>, vector<128x384xf32>, vector<16x384xf32> -> vector<16x384xf32>
    %88 = arith.addf %87, %10 : vector<16x384xf32>
    %c3 = arith.constant 3 : index
    %c0_31 = arith.constant 0 : index
    %c0_32 = arith.constant 0 : index
    %89 = vector.load %arg3[%c3, %c0_31, %c0_32] : memref<4x128x384xf32, #tpu.memory_space<vmem>>, vector<1x128x384xf32>
    %90 = vector.shape_cast %89 : vector<1x128x384xf32> to vector<128x384xf32>
    %cst_33 = arith.constant dense<0.000000e+00> : vector<16x384xf32>
    %91 = tpu.matmul %86, %90, %cst_33 {dimension_numbers = #tpu.dot_dimension_numbers<[1], [0], [0], [1], [0, 0, 1, 1], [], []>} : vector<16x128xf32>, vector<128x384xf32>, vector<16x384xf32> -> vector<16x384xf32>
    %92 = arith.addf %91, %7 : vector<16x384xf32>
    %93 = vector.extract_strided_slice %92 {offsets = [0, 0], sizes = [16, 256], strides = [1, 1]} : vector<16x384xf32> to vector<16x256xf32>
    %94 = vector.extract_strided_slice %88 {offsets = [0, 0], sizes = [16, 256], strides = [1, 1]} : vector<16x384xf32> to vector<16x256xf32>
    %95 = arith.addf %93, %94 : vector<16x256xf32>
    %96 = arith.negf %95 : vector<16x256xf32>
    %97 = math.exp %96 : vector<16x256xf32>
    %cst_34 = arith.constant 1.000000e+00 : f32
    %98 = vector.broadcast %cst_34 : f32 to vector<16x256xf32>
    %99 = arith.addf %98, %97 : vector<16x256xf32>
    %100 = arith.divf %98, %99 : vector<16x256xf32>
    %101 = vector.extract_strided_slice %100 {offsets = [0, 128], sizes = [16, 128], strides = [1, 1]} : vector<16x256xf32> to vector<16x128xf32>
    %102 = vector.extract_strided_slice %92 {offsets = [0, 256], sizes = [16, 128], strides = [1, 1]} : vector<16x384xf32> to vector<16x128xf32>
    %103 = vector.extract_strided_slice %100 {offsets = [0, 0], sizes = [16, 128], strides = [1, 1]} : vector<16x256xf32> to vector<16x128xf32>
    %104 = vector.extract_strided_slice %88 {offsets = [0, 256], sizes = [16, 128], strides = [1, 1]} : vector<16x384xf32> to vector<16x128xf32>
    %105 = arith.mulf %103, %104 : vector<16x128xf32>
    %106 = arith.addf %102, %105 : vector<16x128xf32>
    %107 = math.tanh %106 : vector<16x128xf32>
    %108 = arith.subf %85, %107 : vector<16x128xf32>
    %109 = arith.mulf %101, %108 : vector<16x128xf32>
    %110 = arith.addf %107, %109 : vector<16x128xf32>
    %c0_35 = arith.constant 0 : index
    %c0_36 = arith.constant 0 : index
    %111 = vector.load %arg7[%c0_35, %c0_36] : memref<128x1xf32, #tpu.memory_space<vmem>>, vector<128x1xf32>
    %cst_37 = arith.constant dense<0.000000e+00> : vector<16x1xf32>
    %112 = tpu.matmul %110, %111, %cst_37 {dimension_numbers = #tpu.dot_dimension_numbers<[1], [0], [0], [1], [0, 0, 1, 1], [], []>} : vector<16x128xf32>, vector<128x1xf32>, vector<16x1xf32> -> vector<16x1xf32>
    %c0_38 = arith.constant 0 : index
    %c0_39 = arith.constant 0 : index
    %113 = memref.load %arg8[%c0_38, %c0_39] : memref<1x1xf32, #tpu.memory_space<smem>>
    %114 = vector.broadcast %113 : f32 to vector<16x1xf32>
    %115 = arith.addf %112, %114 : vector<16x1xf32>
    %116 = arith.negf %115 : vector<16x1xf32>
    %117 = math.exp %116 : vector<16x1xf32>
    %cst_40 = arith.constant 1.000000e+00 : f32
    %118 = vector.broadcast %cst_40 : f32 to vector<16x1xf32>
    %119 = arith.addf %118, %117 : vector<16x1xf32>
    %120 = arith.divf %118, %119 : vector<16x1xf32>
    %121 = math.exp %120 : vector<16x1xf32>
    %cst_41 = arith.constant dense<0.000000e+00> : vector<1xf32>
    %122 = vector.multi_reduction <add>, %121, %cst_41 [0] : vector<16x1xf32> to vector<1xf32>
    %123 = vector.shape_cast %122 : vector<1xf32> to vector<1x1xf32>
    %124 = tpu.reciprocal %123 {approx = true} : vector<1x1xf32> -> vector<1x1xf32>
    %125 = arith.mulf %123, %124 : vector<1x1xf32>
    %cst_42 = arith.constant 2.000000e+00 : f32
    %126 = vector.broadcast %cst_42 : f32 to vector<1x1xf32>
    %127 = arith.subf %126, %125 : vector<1x1xf32>
    %128 = arith.mulf %124, %127 : vector<1x1xf32>
    %cst_43 = arith.constant dense<0.000000e+00> : vector<1x128xf32>
    %129 = tpu.matmul %121, %110, %cst_43 {dimension_numbers = #tpu.dot_dimension_numbers<[0], [0], [1], [1], [0, 1, 1, 1], [], []>} : vector<16x1xf32>, vector<16x128xf32>, vector<1x128xf32> -> vector<1x128xf32>
    %130 = vector.broadcast %128 : vector<1x1xf32> to vector<1x128xf32>
    %131 = arith.mulf %129, %130 : vector<1x128xf32>
    %c0_44 = arith.constant 0 : index
    %c0_45 = arith.constant 0 : index
    %c0_46 = arith.constant 0 : index
    %132 = vector.load %arg9[%c0_44, %c0_45, %c0_46] : memref<1x1x128xf32, #tpu.memory_space<vmem>>, vector<1x1x128xf32>
    %133 = vector.shape_cast %132 : vector<1x1x128xf32> to vector<1x128xf32>
    %134 = vector.shape_cast %131 : vector<1x128xf32> to vector<1x1x128xf32>
    tpu.vector_store %arg9[%c0_44, %c0_45, %c0_46], %134 {strides = array<i32>} : memref<1x1x128xf32, #tpu.memory_space<vmem>>, vector<1x1x128xf32>,
    return
  }
  func.func @transform_0(%arg0: i32) -> (i32, i32, i32) {
    %c0_i32 = arith.constant 0 : i32
    %c0_i32_0 = arith.constant 0 : i32
    %c0_i32_1 = arith.constant 0 : i32
    return %arg0, %c0_i32, %c0_i32_0 : i32, i32, i32
  }
  func.func @transform_1(%arg0: i32) -> (i32, i32, i32) {
    %c0_i32 = arith.constant 0 : i32
    %c0_i32_0 = arith.constant 0 : i32
    %c0_i32_1 = arith.constant 0 : i32
    return %arg0, %c0_i32, %c0_i32_0 : i32, i32, i32
  }
  func.func @transform_2(%arg0: i32) -> (i32, i32, i32) {
    %c0_i32 = arith.constant 0 : i32
    %c0_i32_0 = arith.constant 0 : i32
    %c0_i32_1 = arith.constant 0 : i32
    %c0_i32_2 = arith.constant 0 : i32
    return %c0_i32, %c0_i32_0, %c0_i32_1 : i32, i32, i32
  }
  func.func @transform_3(%arg0: i32) -> (i32, i32) {
    %c0_i32 = arith.constant 0 : i32
    %c0_i32_0 = arith.constant 0 : i32
    %c0_i32_1 = arith.constant 0 : i32
    return %c0_i32, %c0_i32_0 : i32, i32
  }
  func.func @transform_4(%arg0: i32) -> (i32, i32) {
    %c0_i32 = arith.constant 0 : i32
    %c0_i32_0 = arith.constant 0 : i32
    %c0_i32_1 = arith.constant 0 : i32
    return %c0_i32, %c0_i32_0 : i32, i32
  }
  func.func @transform_5(%arg0: i32) -> (i32, i32) {
    %c0_i32 = arith.constant 0 : i32
    %c0_i32_0 = arith.constant 0 : i32
    %c0_i32_1 = arith.constant 0 : i32
    return %c0_i32, %c0_i32_0 : i32, i32
  }
  func.func @transform_6(%arg0: i32) -> (i32, i32) {
    %c0_i32 = arith.constant 0 : i32
    %c0_i32_0 = arith.constant 0 : i32
    %c0_i32_1 = arith.constant 0 : i32
    return %c0_i32, %c0_i32_0 : i32, i32
  }
  func.func @transform_7(%arg0: i32) -> (i32, i32) {
    %c0_i32 = arith.constant 0 : i32
    %c0_i32_0 = arith.constant 0 : i32
    %c0_i32_1 = arith.constant 0 : i32
    return %c0_i32, %c0_i32_0 : i32, i32
  }
  func.func @transform_8(%arg0: i32) -> (i32, i32, i32) {
    %c0_i32 = arith.constant 0 : i32
    %c0_i32_0 = arith.constant 0 : i32
    %c0_i32_1 = arith.constant 0 : i32
    return %arg0, %c0_i32, %c0_i32_0 : i32, i32, i32
  }
}

</mosaic_0001>

<bundles_post_ra>
// kernel: tpu_custom_call.1
= control target key start
LH: loop header
LB: loop body
LE: loop exit
PB: predicated region body
PF: predicated region fallthrough
CT: control target
= control target key end

     0   :  { %s4738_s0 = inlined_call_operand.vmem [shape: f32[4,16,128], index: 0, kind: input, shape index: {}]   ;;  %s4739_s1 = inlined_call_operand.vmem [shape: f32[4,16,16], index: 1, kind: input, shape index: {}]   ;;  %s4740_s2 = inlined_call_operand.hbm [shape: f32[4,128,384], index: 2, kind: input, shape index: {}]   ;;  %s4741_s3 = inlined_call_operand.hbm [shape: f32[128,384], index: 3, kind: input, shape index: {}]   ;;  %s4742_s4 = inlined_call_operand.vmem [shape: f32[1,384], index: 4, kind: input, shape index: {}]   ;;  %s4743_s5 = inlined_call_operand.vmem [shape: f32[1,384], index: 5, kind: input, shape index: {}]   ;;  %s4744_s6 = inlined_call_operand.vmem [shape: f32[128,1], index: 6, kind: input, shape index: {}]   ;;  %s4745_s7 = inlined_call_operand.<no memory space> [shape: f32[1,1], index: 7, kind: input, shape index: {}]   ;;  %s4746_s8 = inlined_call_operand.hbm [shape: f32[4,1,128], index: 8, kind: output, shape index: {}]  }
   0x1   :  { %13 = sst [smem:[#allocation2]] %s4745_s7 }
   0x2   :  { %14 = vsyncpa [#allocation4], 0 }
   0x3   :  { %15 = vsyncpa [#allocation7], 0 }
   0x4   :  { %16 = vsyncpa [#allocation5], 0 }
   0x5   :  { %18 = vsyncpa [#allocation5 + $0x1], 0  ;;  %s4190_s29 = smov 0   ;;  %s4192_s30 = smov 0  }
   0x6   :  { %s4194_s9 = smov 0   ;;  %s4196_s10 = smov 0  }
   0x7 LB: > { %s4211_s7 = sadd.s32 4294967295, %s4131_s10   ;;  %s2655_s11 = sadd.s32 4294967294, %s4131_s10   ;;  %s4131_s10 = sphi %s4196_s10, %s4766_s10   ;;  %s4127_s9 = sphi %s4194_s9, %s4765_s9   ;;  %s4123_s30 = sphi %s4192_s30, %s4764_s30   ;;  %s4119_s29 = sphi %s4190_s29, %s4763_s29  }
   0x8   : > { %s4215_s12 = sadd.s32 1, %s4131_s10   ;;  %s209_s13 = sadd.s32 1, %s4127_s9 }
   0x9   : > { %s206_s14 = ssub.s32 %s4131_s10, %s4215_s12  ;;  %p219_p0 = scmp.ne.s32.totalorder %s4127_s9, %s4123_s30 }
   0xa   : > { %p207_p1 = scmp.eq.s32.totalorder %s206_s14, 0  ;;  %p220_p2 = scmp.eq.s32.totalorder %s4211_s7, 3 }
   0xb   : > { %p225_p3 = scmp.ne.s32.totalorder %s4123_s30, %s4119_s29  ;;  %p226_p4 = scmp.eq.s32.totalorder %s2655_s11, 3 }
   0xc   : > { %s4226_s15 = scalar_select %p207_p1, %s4127_s9, %s209_s13  }
   0xd   : > { %p4228_p5 = por %p220_p2, %p219_p0  ;;  %p4232_p6 = por %p226_p4, %p225_p3 }
   0xe   : > { %4750 = sst [smem:[#allocation12_spill]] %s4226_s15  ;;  %p2656_p7 = scmp.ge.s32.totalorder %s4131_s10, 1 }
   0xf   : > { %s4751_s16 = scalar_select %p4228_p5, 1, 0 }
  0x10   : > { %s4752_s17 = scalar_select %p4232_p6, 1, 0 }
  0x11   : > { %p233_p8 = scmp.lt.s32.totalorder %s4131_s10, 5  ;;  %p4747_p9 = scmp.eq.s32.totalorder %s4211_s7, 0 }
  0x12   : > { %s4133_s19 = smov [#allocation3]   ;;  %s4134_s22 = smov [#allocation6]  }
  0x13   : > { %p4239_p10 = pnand %p2656_p7, %p233_p8  ;;  %s245_s20 = sshll.u32 %s4133_s19, 4  ;;  %s246_s20 = int_to_ptr.vmem [resolvable:$true] %s245_s20 }
  0x14   : > { %s258_s23 = sshll.u32 %s4134_s22, 4  ;;  %s4005_s26 = scalar_lea.hbm %s4740_s2, 24576  ;;  %s4251_s23 = int_to_ptr.vmem [resolvable:$true] %s258_s23 }
  0x15   : > { %s4753_s18 = scalar_select %p4239_p10, 1, 0 }
  0x16   : > { %p3851_p11 = pneg %p4239_p10  ;;  %p4006_p13 = scmp.ne.s32.totalorder %s4740_s2, %s4005_s26 }
  0x17   : > { %p4012_p3 = scmp.lt.u32.totalorder %s4005_s26, %s4740_s2 }
  0x18   : > { %p4247_p12 = pnand %p4747_p9, %p3851_p11 }
  0x1a   : > { %p4007_p0 = pneg %p4247_p12 }
  0x1c   : > { %p4008_p1 = pnand %p4007_p0, %p4006_p13 }
  0x1e   : > { %p4009_p2 = pneg %p4008_p1 }
  0x20   : > { %p4014_p4 = pnand %p4012_p3, %p4009_p2 }
  0x22   : > { %4017 = shalt.err (!%p4014_p4)
}
  0x23   : > { %s4018_s14 = scalar_lea.vmem %s246_s20, 24576  ;;  %p4026_p9 = scmp.lt.s32.totalorder %s246_s20, %s246_s20 }
  0x24   : > { %p4019_p7 = scmp.ne.s32.totalorder %s246_s20, %s4018_s14  ;;  %p4027_p6 = scmp.lt.s32.totalorder %s4018_s14, %s4018_s14 }
  0x26   : > { %p4021_p8 = pnand %p4019_p7, %p4007_p0  ;;  %p4028_p5 = por %p4027_p6, %p4026_p9 }
  0x28   : > { %p4022_p11 = pneg %p4021_p8 }
  0x2a   : > { %p4029_p10 = pnand %p4028_p5, %p4022_p11 }
  0x2c   : > { %4032 = shalt.err (!%p4029_p10)
}
  0x2d   : > { %s4135_s19 = smov 384   ;;  %s4136_s22 = smov 24  }
  0x2e   : > { %3854 = dma.hbm_to_vmem [thread:$0]  (!%p4247_p12), %s4740_s2, 24576, %s246_s20, [#allocation4], %s4135_s19, %s4135_s19, %s4136_s22  }
  0x2f   : > { %s4033_s28 = scalar_lea.hbm %s4741_s3, 6144 }
  0x30   : > { %p4034_p13 = scmp.ne.s32.totalorder %s4741_s3, %s4033_s28  ;;  %p4040_p9 = scmp.lt.u32.totalorder %s4033_s28, %s4741_s3 }
  0x32   : > { %p4036_p5 = pnand %p4034_p13, %p4007_p0 }
  0x34   : > { %p4037_p6 = pneg %p4036_p5 }
  0x36   : > { %p4042_p10 = pnand %p4040_p9, %p4037_p6 }
  0x38   : > { %4045 = shalt.err (!%p4042_p10)
}
  0x39   : > { %s4046_s20 = scalar_lea.vmem %s4251_s23, 6144  ;;  %p4054_p4 = scmp.lt.s32.totalorder %s4251_s23, %s4251_s23 }
  0x3a   : > { %p4047_p1 = scmp.ne.s32.totalorder %s4251_s23, %s4046_s20  ;;  %p4055_p7 = scmp.lt.s32.totalorder %s4046_s20, %s4046_s20 }
  0x3c   : > { %p4049_p2 = pnand %p4047_p1, %p4007_p0  ;;  %p4056_p8 = por %p4055_p7, %p4054_p4 }
  0x3e   : > { %p4050_p3 = pneg %p4049_p2 }
  0x40   : > { %p4057_p11 = pnand %p4056_p8, %p4050_p3 }
  0x42   : > { %4060 = shalt.err (!%p4057_p11)
}
  0x43   : > { %3857 = dma.hbm_to_vmem [thread:$0]  (!%p4247_p12), %s4741_s3, 6144, %s4251_s23, [#allocation7], %s4135_s19, %s4135_s19, %s4136_s22  }
  0x44   : > { %p4755_p13 = scmp.ne.s32.totalorder %s4753_s18, 0 }
  0x45   : > { %p4756_p5 = scmp.eq.s32.totalorder (!%p4755_p13), %s4211_s7, 0 }
  0x46   : > { %302 = sbr.rel (%p4755_p13) target bundleno = 2636 (0xa4c), region = 52 }
  0x4d   : > { %4106 = dma.done.wait (%p4756_p5), [#allocation4], 24576   ;;  %p4757_p0 = pmov %p4756_p5 }
  0x4f   : > { %4108 = vsyncadd (%p4757_p0), [#allocation4], 4294942720  ;;  %p4758_p6 = pmov %p4757_p0 }
  0x50   : > { %p4759_p9 = pmov %p4757_p0 }
  0x51   : > { %4110 = dma.done.wait (%p4758_p6), [#allocation7], 6144  }
  0x52   : > { %4112 = vsyncadd (%p4759_p9), [#allocation7], 4294961152  ;;  %p344_p10 = scmp.lt.s32.totalorder %s4211_s7, 3  ;;  %vm440_vm0 = vcmask 130048   ;;  %v359_v4 = vld [vmem:[#allocation6 + $0x8] sm:$0xff]  ;;  %v362_v5 = vld [vmem:[#allocation6 + $0x20] sm:$0xff] }
  0x53   : > { %v4332_v6 = vpack.c.bf16 %v362_v5, %v359_v4  ;;  %v358_v7 = vld [vmem:[#allocation6] sm:$0xff]  ;;  %v361_v8 = vld [vmem:[#allocation6 + $0x18] sm:$0xff]  ;;  %v360_v9 = vld [vmem:[#allocation6 + $0x10] sm:$0xff]  ;;  %v4137_v33 = vmov 0.0   ;;  %vm4140_vm1 = vmmov 0   ;;  %s2334_s24 = sld [smem:[#allocation2]] }
  0x54   : > { %s345_s21 = scalar_select %p344_p10, %s4211_s7, 3  ;;  %v363_v10 = vld [vmem:[#allocation6 + $0x28] sm:$0xff]  ;;  %v365_v11 = vld [vmem:[#allocation6 + $0x38] sm:$0xff]  ;;  %v368_v12 = vld [vmem:[#allocation6 + $0x50] sm:$0xff]  ;;  %v4337_v14 = vpack.c.bf16 %v361_v8, %v358_v7  ;;  %vm2427_vm2 = vcmask 7168  }
  0x55   : > { %v4339_v15 = vpack.c.bf16 %v363_v10, %v360_v9  ;;  %v366_v16 = vld [vmem:[#allocation6 + $0x40] sm:$0xff]  ;;  %v4342_v17 = vpack.c.bf16 %v368_v12, %v365_v11  ;;  %v364_v18 = vld [vmem:[#allocation6 + $0x30] sm:$0xff]  ;;  %v367_v19 = vld [vmem:[#allocation6 + $0x48] sm:$0xff]  ;;  %p4760_p1 = scmp.ne.s32.totalorder %s4751_s16, 0 }
  0x56   : > { %s2697_s23 = sshll.u32 %s345_s21, 4  ;;  %v369_v20 = vld [vmem:[#allocation6 + $0x58] sm:$0xff]  ;;  %v371_v22 = vld [vmem:[#allocation6 + $0x68] sm:$0xff]  ;;  %v374_v23 = vld [vmem:[#allocation6 + $0x80] sm:$0xff]  ;;  %v4351_v26 = vpack.c.bf16 %v367_v19, %v364_v18  ;;  %s342_s21 = sand.u32 1, %s4123_s30  }
  0x57   : > { %s348_s22 = scalar_lea.vmem %s4738_s0, %s2697_s23  ;;  %s4318_s27 = scalar_lea.vmem %s4739_s1, %s2697_s23  ;;  %3267 = vmatprep.subr.bf16.mxu0 %v4339_v15  ;;  %v4345_v21 = vpack.c.bf16 %v369_v20, %v366_v16  ;;  %v372_v24 = vld [vmem:[#allocation6 + $0x70] sm:$0xff]  ;;  %v375_v25 = vld [vmem:[#allocation6 + $0x88] sm:$0xff]  ;;  %v370_v27 = vld [vmem:[#allocation6 + $0x60] sm:$0xff]  ;;  %v4357_v29 = vpack.c.bf16 %v374_v23, %v371_v22 }
  0x58   : > { %v4320_v0 = vld [vmem:[%s348_s22] sm:$0xff]  ;;  %v4322_v1 = vld [vmem:[%s348_s22 + $0x8] sm:$0xff]  ;;  %3269 = vmatpush3.bf16.msra.mxu0 %v4339_v15  ;;  %v4354_v28 = vpack.c.bf16 %v375_v25, %v372_v24  ;;  %v373_v30 = vld [vmem:[#allocation6 + $0x78] sm:$0xff]  ;;  %s2694_s23 = sshll.u32 %s4211_s7, 4  ;;  %s343_s19 = scalar_lea.vmem [#allocation8], %s342_s21 }
  0x59   : > { %v4325_v2 = vld [vmem:[%s4318_s27] sm:$0xff]  ;;  %v3230_v3 = vpack.c.bf16 %v4322_v1, %v4320_v0  ;;  %2919 = vmatprep.mubr.f32.mxu0 %v4320_v0  ;;  %v4335_v13 = vld [vmem:[%s4318_s27 + $0x8] sm:$0xff]  ;;  %3271 = vmatprep.subr.bf16.mxu0 %v4345_v21  ;;  %v381_v32 = vld [vmem:[#allocation6 + $0xb8] sm:$0xff]  ;;  %v4362_v36 = vpack.c.bf16 %v373_v30, %v370_v27  ;;  %s2566_s18 = sshll.u32 %s343_s19, 4  ;;  %s4696_s26 = scalar_lea.hbm %s4746_s8, %s2694_s23  ;;  %s4698_s18 = int_to_ptr.vmem [resolvable:$true] %s2566_s18 }
  0x5a   : > { %2884 = vmatprep.mubr.msk.f32.mxu1 %vm440_vm0, %v4325_v2  ;;  %v378_v31 = vld [vmem:[#allocation6 + $0xa0] sm:$0xff]  ;;  %v377_v34 = vld [vmem:[#allocation6 + $0x98] sm:$0xff]  ;;  %v380_v35 = vld [vmem:[#allocation6 + $0xb0] sm:$0xff]  ;;  %s4061_s28 = scalar_lea.vmem %s4698_s18, 16  ;;  %s4141_s7 = smov [#allocation8]  }
  0x5b   : > { %3231 = vmatprep.subr.bf16.mxu1 %v3230_v3  ;;  %v376_v37 = vld [vmem:[#allocation6 + $0x90] sm:$0xff]  ;;  %v4365_v38 = vpack.c.bf16 %v381_v32, %v378_v31  ;;  %v4368_v39 = vpack.c.bf16 %v380_v35, %v377_v34  ;;  %v379_v40 = vld [vmem:[#allocation6 + $0xa8] sm:$0xff]  ;;  %v386_v44 = vld [vmem:[#allocation6 + $0xe0] sm:$0xff]  ;;  %p4062_p12 = scmp.ne.s32.totalorder %s4698_s18, %s4061_s28  ;;  %s4065_s11 = sshll.u32 %s4141_s7, 4  ;;  %s4066_s11 = int_to_ptr.vmem [resolvable:$false] %s4065_s11 }
  0x5c   : > { %3233 = vmatpush3.bf16.msra.mxu1 %v3230_v3  ;;  %3273 = vmatpush3.bf16.msra.mxu0 %v4345_v21  ;;  %v384_v41 = vld [vmem:[#allocation6 + $0xd0] sm:$0xff]  ;;  %v387_v42 = vld [vmem:[#allocation6 + $0xe8] sm:$0xff]  ;;  %v4372_v45 = vpack.c.bf16 %v379_v40, %v376_v37  ;;  %v382_v46 = vld [vmem:[#allocation6 + $0xc0] sm:$0xff]  ;;  %s4067_s13 = scalar_lea.vmem %s4066_s11, 32  ;;  %p4068_p4 = scmp.lt.s32.totalorder %s4698_s18, %s4066_s11 }
  0x5d   : > { %3235 = vmatprep.subr.bf16.mxu1 %v4332_v6  ;;  %3275 = vmatprep.subr.bf16.mxu0 %v4354_v28  ;;  %v383_v43 = vld [vmem:[#allocation6 + $0xc8] sm:$0xff]  ;;  %v4375_v47 = vpack.c.bf16 %v387_v42, %v384_v41  ;;  %v385_v49 = vld [vmem:[#allocation6 + $0xd8] sm:$0xff]  ;;  %v390_v50 = vld [vmem:[#allocation6 + $0x100] sm:$0xff]  ;;  %p4063_p2 = pnand %p4062_p12, %p4760_p1  ;;  %p4069_p7 = scmp.lt.s32.totalorder %s4067_s13, %s4061_s28 }
  0x5e   : > { %v4378_v48 = vpack.c.bf16 %v386_v44, %v383_v43  ;;  %v393_v51 = vld [vmem:[#allocation6 + $0x118] sm:$0xff]  ;;  %v392_v53 = vld [vmem:[#allocation6 + $0x110] sm:$0xff]  ;;  %v4382_v54 = vpack.c.bf16 %v385_v49, %v382_v46  ;;  %v391_v58 = vld [vmem:[#allocation6 + $0x108] sm:$0xff] }
  0x5f   : > { %2885 = vmatmul.mubr.msk.f32.vlgmr.msra.gmra.mrb[0].mxu1 %vm440_vm0, %v4335_v13  ;;  %v389_v52 = vld [vmem:[#allocation6 + $0xf8] sm:$0xff]  ;;  %v388_v55 = vld [vmem:[#allocation6 + $0xf0] sm:$0xff]  ;;  %v4385_v56 = vpack.c.bf16 %v393_v51, %v390_v50  ;;  %v399_v60 = vld [vmem:[#allocation6 + $0x148] sm:$0xff]  ;;  %p4064_p3 = pneg %p4063_p2  ;;  %p4070_p8 = por %p4069_p7, %p4068_p4 }
  0x60   : > { %3237 = vmatpush1.bf16.msra.mxu1 %v4337_v14  ;;  %586 = vmatprep.mubr.f32.mxu1 %v4137_v33  ;;  %v4388_v57 = vpack.c.bf16 %v392_v53, %v389_v52  ;;  %v396_v59 = vld [vmem:[#allocation6 + $0x130] sm:$0xff]  ;;  %v395_v61 = vld [vmem:[#allocation6 + $0x128] sm:$0xff]  ;;  %v398_v62 = vld [vmem:[#allocation6 + $0x140] sm:$0xff]  ;;  %v4392_v63 = vpack.c.bf16 %v391_v58, %v388_v55 }
  0x61   : > { %3239 = vmatprep.subr.bf16.mxu1 %v4342_v17  ;;  %3277 = vmatpush3.bf16.msra.mxu0 %v4354_v28  ;;  %v394_v3 = vld [vmem:[#allocation6 + $0x120] sm:$0xff]  ;;  %v4395_v4 = vpack.c.bf16 %v399_v60, %v396_v59  ;;  %v4398_v5 = vpack.c.bf16 %v398_v62, %v395_v61  ;;  %v397_v7 = vld [vmem:[#allocation6 + $0x138] sm:$0xff]  ;;  %v404_v11 = vld [vmem:[#allocation6 + $0x170] sm:$0xff]  ;;  %p4071_p11 = pnand %p4070_p8, %p4064_p3 }
  0x62   : > { %3279 = vmatprep.subr.bf16.mxu0 %v4365_v38  ;;  %v402_v8 = vld [vmem:[#allocation6 + $0x160] sm:$0xff]  ;;  %v405_v9 = vld [vmem:[#allocation6 + $0x178] sm:$0xff]  ;;  %v4402_v12 = vpack.c.bf16 %v397_v7, %v394_v3  ;;  %v400_v16 = vld [vmem:[#allocation6 + $0x150] sm:$0xff] }
  0x63   : > { %v401_v10 = vld [vmem:[#allocation6 + $0x158] sm:$0xff]  ;;  %v4405_v18 = vpack.c.bf16 %v405_v9, %v402_v8  ;;  %v403_v20 = vld [vmem:[#allocation6 + $0x168] sm:$0xff]  ;;  %v676_v22 = vld [vmem:[#allocation3 + $0x10] sm:$0xff] }
  0x64   : > { %3241 = vmatpush1.bf16.msra.mxu1 %v4351_v26  ;;  %v4408_v19 = vpack.c.bf16 %v404_v11, %v401_v10  ;;  %v679_v23 = vld [vmem:[#allocation3 + $0x28] sm:$0xff]  ;;  %v678_v25 = vld [vmem:[#allocation3 + $0x20] sm:$0xff]  ;;  %v4412_v27 = vpack.c.bf16 %v403_v20, %v400_v16  ;;  %v677_v34 = vld [vmem:[#allocation3 + $0x18] sm:$0xff] }
  0x65   : > { %3243 = vmatprep.subr.bf16.mxu1 %v4357_v29  ;;  %3281 = vmatpush3.bf16.msra.mxu0 %v4365_v38  ;;  %v675_v24 = vld [vmem:[#allocation3 + $0x8] sm:$0xff]  ;;  %v674_v30 = vld [vmem:[#allocation3] sm:$0xff]  ;;  %v3330_v31 = vpack.c.bf16 %v679_v23, %v676_v22  ;;  %v685_v37 = vld [vmem:[#allocation3 + $0x58] sm:$0xff] }
  0x66   : > { %3283 = vmatprep.subr.bf16.mxu0 %v4375_v47  ;;  %v3298_v32 = vpack.c.bf16 %v678_v25, %v675_v24  ;;  %v682_v35 = vld [vmem:[#allocation3 + $0x40] sm:$0xff]  ;;  %v681_v40 = vld [vmem:[#allocation3 + $0x38] sm:$0xff]  ;;  %v684_v41 = vld [vmem:[#allocation3 + $0x50] sm:$0xff]  ;;  %v3300_v42 = vpack.c.bf16 %v677_v34, %v674_v30 }
  0x67   : > { %v680_v43 = vld [vmem:[#allocation3 + $0x30] sm:$0xff]  ;;  %v3334_v44 = vpack.c.bf16 %v685_v37, %v682_v35  ;;  %v3302_v46 = vpack.c.bf16 %v684_v41, %v681_v40  ;;  %v683_v49 = vld [vmem:[#allocation3 + $0x48] sm:$0xff]  ;;  %v690_v53 = vld [vmem:[#allocation3 + $0x80] sm:$0xff] }
  0x68   : > { %3245 = vmatpush1.bf16.msra.mxu1 %v4362_v36  ;;  %v688_v50 = vld [vmem:[#allocation3 + $0x70] sm:$0xff]  ;;  %v691_v51 = vld [vmem:[#allocation3 + $0x88] sm:$0xff]  ;;  %v3304_v55 = vpack.c.bf16 %v683_v49, %v680_v43  ;;  %v686_v58 = vld [vmem:[#allocation3 + $0x60] sm:$0xff] }
  0x69   : > { %3247 = vmatprep.subr.bf16.mxu1 %v4368_v39  ;;  %3285 = vmatpush3.bf16.msra.mxu0 %v4375_v47  ;;  %v687_v52 = vld [vmem:[#allocation3 + $0x68] sm:$0xff]  ;;  %v3338_v59 = vpack.c.bf16 %v691_v51, %v688_v50  ;;  %v689_v61 = vld [vmem:[#allocation3 + $0x78] sm:$0xff]  ;;  %v694_v62 = vld [vmem:[#allocation3 + $0xa0] sm:$0xff] }
  0x6a   : > { %3287 = vmatprep.subr.bf16.mxu0 %v4385_v56  ;;  %v3306_v60 = vpack.c.bf16 %v690_v53, %v687_v52  ;;  %v697_v3 = vld [vmem:[#allocation3 + $0xb8] sm:$0xff]  ;;  %v696_v8 = vld [vmem:[#allocation3 + $0xb0] sm:$0xff]  ;;  %v3308_v9 = vpack.c.bf16 %v689_v61, %v686_v58  ;;  %v695_v20 = vld [vmem:[#allocation3 + $0xa8] sm:$0xff] }
  0x6b   : > { %v693_v7 = vld [vmem:[#allocation3 + $0x98] sm:$0xff]  ;;  %v692_v10 = vld [vmem:[#allocation3 + $0x90] sm:$0xff]  ;;  %v3342_v11 = vpack.c.bf16 %v697_v3, %v694_v62  ;;  %v703_v23 = vld [vmem:[#allocation3 + $0xe8] sm:$0xff] }
  0x6c   : > { %3249 = vmatpush1.bf16.msra.mxu1 %v4372_v45  ;;  %v3310_v16 = vpack.c.bf16 %v696_v8, %v693_v7  ;;  %v700_v22 = vld [vmem:[#allocation3 + $0xd0] sm:$0xff]  ;;  %v699_v24 = vld [vmem:[#allocation3 + $0xc8] sm:$0xff]  ;;  %v702_v25 = vld [vmem:[#allocation3 + $0xe0] sm:$0xff]  ;;  %v3312_v30 = vpack.c.bf16 %v695_v20, %v692_v10 }
  0x6d   : > { %3251 = vmatprep.subr.bf16.mxu1 %v4378_v48  ;;  %3289 = vmatpush3.bf16.msra.mxu0 %v4385_v56  ;;  %v3314_v34 = vpack.c.bf16 %v702_v25, %v699_v24  ;;  %v701_v35 = vld [vmem:[#allocation3 + $0xd8] sm:$0xff]  ;;  %v706_v37 = vld [vmem:[#allocation3 + $0x100] sm:$0xff]  ;;  %v707_v50 = vld [vmem:[#allocation3 + $0x108] sm:$0xff] }
  0x6e   : > { %3291 = vmatprep.subr.bf16.mxu0 %v4395_v4  ;;  %v709_v40 = vld [vmem:[#allocation3 + $0x118] sm:$0xff]  ;;  %v712_v51 = vld [vmem:[#allocation3 + $0x130] sm:$0xff]  ;;  %v715_v52 = vld [vmem:[#allocation3 + $0x148] sm:$0xff] }
  0x6f   : > { %v705_v41 = vld [vmem:[#allocation3 + $0xf8] sm:$0xff]  ;;  %v711_v53 = vld [vmem:[#allocation3 + $0x128] sm:$0xff]  ;;  %v718_v3 = vld [vmem:[#allocation3 + $0x160] sm:$0xff] }
  0x70   : > { %3253 = vmatpush1.bf16.msra.mxu1 %v4382_v54  ;;  %v713_v62 = vld [vmem:[#allocation3 + $0x138] sm:$0xff]  ;;  %v716_v20 = vld [vmem:[#allocation3 + $0x150] sm:$0xff] }
  0x71   : > { %3255 = vmatprep.subr.bf16.mxu1 %v4388_v57  ;;  %3293 = vmatpush3.bf16.msra.mxu0 %v4395_v4  ;;  %v721_v7 = vld [vmem:[#allocation3 + $0x178] sm:$0xff] }
  0x72   : > { %3295 = vmatprep.subr.bf16.mxu0 %v4405_v18  ;;  %v717_v8 = vld [vmem:[#allocation3 + $0x158] sm:$0xff] }
  0x74   : > { %3257 = vmatpush1.bf16.msra.mxu1 %v4392_v63 }
  0x75   : > { %3259 = vmatprep.subr.bf16.mxu1 %v4398_v5  ;;  %3297 = vmatpush3.bf16.msra.mxu0 %v4405_v18 }
  0x76   : > { %3331 = vmatprep.subr.bf16.mxu0 %v3330_v31 }
  0x78   : > { %3261 = vmatpush1.bf16.msra.mxu1 %v4402_v12  ;;  %2920 = vmatmul.mubr.f32.vlgmr.msra.gmra.mrb[0].mxu0 %v4322_v1 }
  0x79   : > { %3263 = vmatprep.subr.bf16.mxu1 %v4408_v19  ;;  %3333 = vmatpush3.bf16.msra.mxu0 %v3330_v31  ;;  %v698_v31 = vld [vmem:[#allocation3 + $0xc0] sm:$0xff] }
  0x7a   : > { %3335 = vmatprep.subr.bf16.mxu0 %v3334_v44  ;;  %v3316_v43 = vpack.c.bf16 %v701_v35, %v698_v31 }
  0x7c   : > { %3265 = vmatpush1.bf16.msra.mxu1 %v4412_v27 }
  0x7d   : > { %3299 = vmatprep.subr.bf16.mxu1 %v3298_v32  ;;  %3337 = vmatpush3.bf16.msra.mxu0 %v3334_v44  ;;  %v3346_v32 = vpack.c.bf16 %v703_v23, %v700_v22  ;;  %v704_v44 = vld [vmem:[#allocation3 + $0xf0] sm:$0xff]  ;;  %v719_v22 = vld [vmem:[#allocation3 + $0x168] sm:$0xff] }
  0x7e   : > { %3339 = vmatprep.subr.bf16.mxu0 %v3338_v59  ;;  %v3320_v58 = vpack.c.bf16 %v707_v50, %v704_v44  ;;  %v3328_v23 = vpack.c.bf16 %v719_v22, %v716_v20 }
  0x7f   : > { %587 = vmatmul.mubr.f32.vlgmr.msra.gmra.mrb[2].mxu1 %v4320_v0 }
  0x80   : > { %3301 = vmatpush1.bf16.msra.mxu1 %v3300_v42  ;;  %592 = vmatprep.mubr.f32.mxu1 %v4137_v33  ;;  %v708_v42 = vld [vmem:[#allocation3 + $0x110] sm:$0xff] }
  0x81   : > { %3303 = vmatprep.subr.bf16.mxu1 %v3302_v46  ;;  %3341 = vmatpush3.bf16.msra.mxu0 %v3338_v59  ;;  %v3350_v46 = vpack.c.bf16 %v709_v40, %v706_v37  ;;  %v3318_v49 = vpack.c.bf16 %v708_v42, %v705_v41  ;;  %v710_v59 = vld [vmem:[#allocation3 + $0x120] sm:$0xff]  ;;  %v408_v37 = vlaneseq }
  0x82   : > { %3343 = vmatprep.subr.bf16.mxu0 %v3342_v11  ;;  %v3324_v10 = vpack.c.bf16 %v713_v62, %v710_v59  ;;  %v423_v42 = vld [vmem:[%s4743_s5] sm:$0x7] }
  0x83   : > { %593 = vmatmul.mubr.f32.gmra.mrb[4].mxu1 %v4322_v1  ;;  %v409_v40 = vshrl.u32 %v408_v37, 7 }
  0x84   : > { %3305 = vmatpush1.bf16.msra.mxu1 %v3304_v55  ;;  %786 = vmatprep.mubr.f32.mxu1 %v4137_v33  ;;  %v714_v55 = vld [vmem:[#allocation3 + $0x140] sm:$0xff] }
  0x85   : > { %3307 = vmatprep.subr.bf16.mxu1 %v3306_v60  ;;  %3345 = vmatpush3.bf16.msra.mxu0 %v3342_v11  ;;  %v3354_v60 = vpack.c.bf16 %v715_v52, %v712_v51  ;;  %v3322_v61 = vpack.c.bf16 %v714_v55, %v711_v53  ;;  %v3358_v11 = vpack.c.bf16 %v721_v7, %v718_v3  ;;  %v410_v41 = vsub.s32 0, %v409_v40 }
  0x86   : > { %3347 = vmatprep.subr.bf16.mxu0 %v3346_v32  ;;  %v414_v50 = vsub.s32 1, %v409_v40 }
  0x88   : > { %3309 = vmatpush1.bf16.msra.mxu1 %v3308_v9  ;;  %v720_v9 = vld [vmem:[#allocation3 + $0x170] sm:$0xff]  ;;  %v432_v55 = vrot.slane %v423_v42, %v414_v50 }
  0x89   : > { %3311 = vmatprep.subr.bf16.mxu1 %v3310_v16  ;;  %3349 = vmatpush3.bf16.msra.mxu0 %v3346_v32  ;;  %v3326_v16 = vpack.c.bf16 %v720_v9, %v717_v8  ;;  %v1144_v32 = vld [vmem:[#allocation3 + $0x190] sm:$0xff] }
  0x8a   : > { %3351 = vmatprep.subr.bf16.mxu0 %v3350_v46 }
  0x8c   : > { %3313 = vmatpush1.bf16.msra.mxu1 %v3312_v30 }
  0x8d   : > { %3315 = vmatprep.subr.bf16.mxu1 %v3314_v34  ;;  %3353 = vmatpush3.bf16.msra.mxu0 %v3350_v46  ;;  %v1147_v34 = vld [vmem:[#allocation3 + $0x1a8] sm:$0xff]  ;;  %v428_v46 = vrot.slane %v423_v42, %v410_v41 }
  0x8e   : > { %3355 = vmatprep.subr.bf16.mxu0 %v3354_v60  ;;  %v4442_v35 = vpack.c.bf16 %v1147_v34, %v1144_v32 }
  0x90   : > { %3317 = vmatpush1.bf16.msra.mxu1 %v3316_v43  ;;  %v406_v43 = vld [vmem:[%s4742_s4] sm:$0x7] }
  0x91   : > { %3319 = vmatprep.subr.bf16.mxu1 %v3318_v49  ;;  %3357 = vmatpush3.bf16.msra.mxu0 %v3354_v60  ;;  %v411_v44 = vrot.slane %v406_v43, %v410_v41  ;;  %v415_v53 = vrot.slane %v406_v43, %v414_v50 }
  0x92   : > { %3359 = vmatprep.subr.bf16.mxu0 %v3358_v11 }
  0x93   : > { %v4451_v49 = vadd.f32 %v428_v46, %v411_v44  ;;  %v4454_v3 = vadd.f32 %v432_v55, %v415_v53 }
  0x94   : > { %3321 = vmatpush1.bf16.msra.mxu1 %v3320_v58 }
  0x95   : > { %3323 = vmatprep.subr.bf16.mxu1 %v3322_v61  ;;  %3361 = vmatpush3.bf16.msra.mxu0 %v3358_v11 }
  0x96   : > { %3399 = vmatprep.subr.bf16.mxu0 %v4339_v15 }
  0x98   : > { %3325 = vmatpush1.bf16.msra.mxu1 %v3324_v10 }
  0x99   : > { %3327 = vmatprep.subr.bf16.mxu1 %v3326_v16 }
  0x9c   : > { %3329 = vmatpush1.bf16.msra.mxu1 %v3328_v23 }
 0x132   : > { %v2886_v24 = vpop.f32.mrb[0].mxu1 }
 0x133   : > { %v513_v25 = vpop.f32.mrb[1].mxu1 }
 0x134   : > { %787 = vmatmul.mubr.f32.vlgmr.msra.gmra.mrb[2].mxu1 %v513_v25  ;;  %2954 = vmatprep.mubr.f32.mxu0 %v513_v25  ;;  %v418_v25 = vsub.s32 2, %v409_v40 }
 0x135   : > { %2955 = vmatmul.mubr.f32.vlgmr.msra.gmra.mrb[2].mxu0 %v2886_v24  ;;  %792 = vmatprep.mubr.f32.mxu1 %v4137_v33 }
 0x136   : > { %3401 = vmatpush3.bf16.msra.mxu0 %v4339_v15  ;;  %v4459_v34 = vrot.slane %v423_v42, %v418_v25  ;;  %v4461_v37 = vrot.slane %v406_v43, %v418_v25  ;;  %v1159_v25 = vld [vmem:[#allocation3 + $0x208] sm:$0xff] }
 0x137   : > { %3403 = vmatprep.subr.bf16.mxu0 %v4345_v21 }
 0x138   : > { %793 = vmatmul.mubr.f32.gmra.mrb[4].mxu1 %v2886_v24 }
 0x139   : > { %2961 = vmatprep.mubr.msk.f32.mxu1 %vm440_vm0, %v4325_v2 }
 0x13a   : > { %3405 = vmatpush3.bf16.msra.mxu0 %v4345_v21 }
 0x13b   : > { %3407 = vmatprep.subr.bf16.mxu0 %v4354_v28 }
 0x13e   : > { %3409 = vmatpush3.bf16.msra.mxu0 %v4354_v28 }
 0x13f   : > { %3411 = vmatprep.subr.bf16.mxu0 %v4365_v38 }
 0x142   : > { %3413 = vmatpush3.bf16.msra.mxu0 %v4365_v38 }
 0x143   : > { %3415 = vmatprep.subr.bf16.mxu0 %v4375_v47 }
 0x146   : > { %3417 = vmatpush3.bf16.msra.mxu0 %v4375_v47 }
 0x147   : > { %3419 = vmatprep.subr.bf16.mxu0 %v4385_v56 }
 0x14a   : > { %3421 = vmatpush3.bf16.msra.mxu0 %v4385_v56 }
 0x14b   : > { %3423 = vmatprep.subr.bf16.mxu0 %v4395_v4  ;;  %v2921_v30 = vpop.f32.mrb[0].mxu0 }
 0x14c   : > { %v665_v31 = vpop.f32.mrb[1].mxu0  ;;  %v671_v53 = vadd.f32 %v2921_v30, %v4459_v34 }
 0x14d   : > { %v666_v44 = vadd.f32 %v665_v31, %v4459_v34 }
 0x14e   : > { %3425 = vmatpush3.bf16.msra.mxu0 %v4395_v4 }
 0x14f   : > { %3427 = vmatprep.subr.bf16.mxu0 %v4405_v18 }
 0x152   : > { %3429 = vmatpush3.bf16.msra.mxu0 %v4405_v18 }
 0x153   : > { %3463 = vmatprep.subr.bf16.mxu0 %v4442_v35 }
 0x207   : > { %v788_v51 = vpop.f32.mrb[2].mxu1 }
 0x208   : > { %v3794_v52 = vadd.f32 %v4451_v49, %v788_v51  ;;  %v790_v58 = vpop.f32.mrb[3].mxu1  ;;  %v2956_v59 = vpop.f32.mrb[2].mxu0 }
 0x209   : > { %v865_v60 = vpop.f32.mrb[3].mxu0  ;;  %v3796_v10 = vadd.f32 %v4454_v3, %v790_v58 }
 0x20a   : > { %v2669_v61 = vmul.f32 -1.442695, %v3794_v52  ;;  %v866_v50 = vadd.f32 %v865_v60, %v4461_v37 }
 0x20b   : > { %v794_v62 = vpop.f32.mrb[4].mxu1  ;;  %v2670_v11 = vmul.f32 -1.442695, %v3796_v10 }
 0x20c   : > { %3909 = vpow2.f32 %v2669_v61  ;;  %v3798_v7 = vadd.f32 %v4451_v49, %v794_v62  ;;  %v796_v8 = vpop.f32.mrb[5].mxu1  ;;  %v871_v61 = vadd.f32 %v2956_v59, %v4461_v37  ;;  %v1153_v59 = vld [vmem:[#allocation3 + $0x1d8] sm:$0xff] }
 0x20d   : > { %v3800_v16 = vadd.f32 %v4454_v3, %v796_v8 }
 0x20e   : > { %v2671_v9 = vmul.f32 -1.442695, %v3798_v7 }
 0x20f   : > { %v2672_v23 = vmul.f32 -1.442695, %v3800_v16  ;;  %v1150_v16 = vld [vmem:[#allocation3 + $0x1c0] sm:$0xff] }
 0x210   : > { %3911 = vpow2.f32 %v2671_v9 }
 0x211   : > { %3913 = vpow2.f32 %v2670_v11 }
 0x216   : > { %v3910_v20 = vpop.eup %3909 }
 0x217   : > { %v890_v22 = vadd.f32 1.0, %v3910_v20 }
 0x219   : > { %3915 = vrcp.f32 %v890_v22 }
 0x21a   : > { %v3912_v24 = vpop.eup %3911  ;;  %3917 = vpow2.f32 %v2672_v23  ;;  %v3466_v23 = vpack.c.bf16 %v1153_v59, %v1150_v16  ;;  %v1154_v16 = vld [vmem:[#allocation3 + $0x1e0] sm:$0xff]  ;;  %v1157_v59 = vld [vmem:[#allocation3 + $0x1f8] sm:$0xff] }
 0x21b   : > { %v892_v32 = vadd.f32 1.0, %v3912_v24  ;;  %v3914_v41 = vpop.eup %3913  ;;  %v1156_v24 = vld [vmem:[#allocation3 + $0x1f0] sm:$0xff] }
 0x21c   : > { %v891_v55 = vadd.f32 1.0, %v3914_v41  ;;  %v1165_v41 = vld [vmem:[#allocation3 + $0x238] sm:$0xff] }
 0x21d   : > { %3919 = vrcp.f32 %v892_v32  ;;  %v1162_v32 = vld [vmem:[#allocation3 + $0x220] sm:$0xff] }
 0x223   : > { %v3916_v46 = vpop.eup %3915 }
 0x224   : > { %v902_v51 = vmul.f32 %v3916_v46, %v666_v44  ;;  %v3918_v52 = vpop.eup %3917  ;;  %v3474_v44 = vpack.c.bf16 %v1165_v41, %v1162_v32  ;;  %v1168_v46 = vld [vmem:[#allocation3 + $0x250] sm:$0xff]  ;;  %v1167_v32 = vld [vmem:[#allocation3 + $0x248] sm:$0xff]  ;;  %v1170_v41 = vld [vmem:[#allocation3 + $0x260] sm:$0xff] }
 0x225   : > { %v893_v62 = vadd.f32 1.0, %v3918_v52  ;;  %v1177_v52 = vld [vmem:[#allocation3 + $0x298] sm:$0xff] }
 0x226   : > { %v904_v58 = vadd.f32 %v902_v51, %v866_v50  ;;  %v1174_v51 = vld [vmem:[#allocation3 + $0x280] sm:$0xff] }
 0x227   : > { %v3920_v40 = vpop.eup %3919 }
 0x228   : > { %3921 = vtanh.f32 %v904_v58  ;;  %v903_v42 = vmul.f32 %v3920_v40, %v671_v53  ;;  %v1143_v53 = vld [vmem:[#allocation3 + $0x188] sm:$0xff]  ;;  %v1142_v40 = vld [vmem:[#allocation3 + $0x180] sm:$0xff] }
 0x229   : > { %3923 = vrcp.f32 %v891_v55  ;;  %v1146_v55 = vld [vmem:[#allocation3 + $0x1a0] sm:$0xff] }
 0x22a   : > { %v905_v43 = vadd.f32 %v903_v42, %v871_v61  ;;  %v3430_v58 = vpack.c.bf16 %v1146_v55, %v1143_v53  ;;  %v1145_v61 = vld [vmem:[#allocation3 + $0x198] sm:$0xff]  ;;  %v1172_v55 = vld [vmem:[#allocation3 + $0x270] sm:$0xff] }
 0x22b   : > { %v1149_v42 = vld [vmem:[#allocation3 + $0x1b8] sm:$0xff] }
 0x22c   : > { %3925 = vtanh.f32 %v905_v43  ;;  %v1152_v43 = vld [vmem:[#allocation3 + $0x1d0] sm:$0xff] }
 0x22d   : > { %3927 = vrcp.f32 %v893_v62  ;;  %v3432_v62 = vpack.c.bf16 %v1145_v61, %v1142_v40  ;;  %v1179_v61 = vld [vmem:[#allocation3 + $0x2a8] sm:$0xff] }
 0x232   : > { %v3922_v31 = vpop.eup %3921 }
 0x233   : > { %v908_v7 = vsub.f32 %v4320_v0, %v3922_v31  ;;  %v3924_v60 = vpop.eup %3923 }
 0x235   : > { %v910_v8 = vmul.f32 %v3924_v60, %v908_v7  ;;  %v1148_v7 = vld [vmem:[#allocation3 + $0x1b0] sm:$0xff]  ;;  %v1151_v60 = vld [vmem:[#allocation3 + $0x1c8] sm:$0xff] }
 0x236   : > { %v3926_v9 = vpop.eup %3925 }
 0x237   : > { %v4468_v10 = vadd.f32 %v3922_v31, %v910_v8  ;;  %v909_v30 = vsub.f32 %v4322_v1, %v3926_v9  ;;  %v3928_v11 = vpop.eup %3927  ;;  %v3470_v1 = vpack.c.bf16 %v1159_v25, %v1156_v24  ;;  %v3434_v31 = vpack.c.bf16 %v1152_v43, %v1149_v42  ;;  %v1155_v8 = vld [vmem:[#allocation3 + $0x1e8] sm:$0xff]  ;;  %v1182_v42 = vld [vmem:[#allocation3 + $0x2c0] sm:$0xff] }
 0x238   : > { %v3440_v24 = vpack.c.bf16 %v1157_v59, %v1154_v16  ;;  %v3454_v43 = vpack.c.bf16 %v1182_v42, %v1179_v61  ;;  %v1184_v59 = vld [vmem:[#allocation3 + $0x2d0] sm:$0xff] }
 0x239   : > { %2996 = vmatprep.mubr.f32.mxu0 %v4468_v10  ;;  %v911_v20 = vmul.f32 %v3928_v11, %v909_v30  ;;  %v3436_v30 = vpack.c.bf16 %v1151_v60, %v1148_v7  ;;  %v1180_v7 = vld [vmem:[#allocation3 + $0x2b0] sm:$0xff] }
 0x23b   : > { %v4472_v22 = vadd.f32 %v3926_v9, %v911_v20  ;;  %v1158_v9 = vld [vmem:[#allocation3 + $0x200] sm:$0xff]  ;;  %v1161_v20 = vld [vmem:[#allocation3 + $0x218] sm:$0xff] }
 0x23c   : > { %v3438_v11 = vpack.c.bf16 %v1158_v9, %v1155_v8  ;;  %v1183_v8 = vld [vmem:[#allocation3 + $0x2c8] sm:$0xff] }
 0x23d   : > { %2997 = vmatmul.mubr.f32.vlgmr.msra.gmra.mrb[4].mxu0 %v4472_v22  ;;  %v3362_v0 = vpack.c.bf16 %v4472_v22, %v4468_v10  ;;  %v3486_v9 = vpack.c.bf16 %v1183_v8, %v1180_v7 }
 0x23e   : > { %3465 = vmatpush3.bf16.msra.mxu0 %v4442_v35  ;;  %v1171_v35 = vld [vmem:[#allocation3 + $0x268] sm:$0xff] }
 0x23f   : > { %3363 = vmatprep.subr.bf16.mxu1 %v3362_v0  ;;  %3467 = vmatprep.subr.bf16.mxu0 %v3466_v23  ;;  %v3478_v50 = vpack.c.bf16 %v1171_v35, %v1168_v46  ;;  %v3446_v46 = vpack.c.bf16 %v1170_v41, %v1167_v32  ;;  %v1166_v35 = vld [vmem:[#allocation3 + $0x240] sm:$0xff] }
 0x240   : > { %3365 = vmatpush3.bf16.msra.mxu1 %v3362_v0  ;;  %v1160_v0 = vld [vmem:[#allocation3 + $0x210] sm:$0xff] }
 0x241   : > { %3367 = vmatprep.subr.bf16.mxu1 %v4332_v6 }
 0x242   : > { %3469 = vmatpush3.bf16.msra.mxu0 %v3466_v23  ;;  %v1164_v23 = vld [vmem:[#allocation3 + $0x230] sm:$0xff] }
 0x243   : > { %2962 = vmatmul.mubr.msk.f32.vlgmr.msra.gmra.mrb[6].mxu1 %vm440_vm0, %v4335_v13  ;;  %3471 = vmatprep.subr.bf16.mxu0 %v3470_v1  ;;  %v3482_v13 = vpack.c.bf16 %v1177_v52, %v1174_v51  ;;  %v3442_v25 = vpack.c.bf16 %v1164_v23, %v1161_v20  ;;  %v1173_v51 = vld [vmem:[#allocation3 + $0x278] sm:$0xff]  ;;  %v1176_v52 = vld [vmem:[#allocation3 + $0x290] sm:$0xff]  ;;  %v1187_v20 = vld [vmem:[#allocation3 + $0x2e8] sm:$0xff] }
 0x244   : > { %3369 = vmatpush1.bf16.msra.mxu1 %v4337_v14  ;;  %1053 = vmatprep.mubr.f32.mxu1 %v4137_v33  ;;  %v3450_v53 = vpack.c.bf16 %v1176_v52, %v1173_v51  ;;  %v1186_v23 = vld [vmem:[#allocation3 + $0x2e0] sm:$0xff] }
 0x245   : > { %3371 = vmatprep.subr.bf16.mxu1 %v4342_v17 }
 0x246   : > { %3473 = vmatpush3.bf16.msra.mxu0 %v3470_v1  ;;  %v1163_v1 = vld [vmem:[#allocation3 + $0x228] sm:$0xff] }
 0x247   : > { %3475 = vmatprep.subr.bf16.mxu0 %v3474_v44 }
 0x248   : > { %3373 = vmatpush1.bf16.msra.mxu1 %v4351_v26 }
 0x249   : > { %3375 = vmatprep.subr.bf16.mxu1 %v4357_v29 }
 0x24a   : > { %3477 = vmatpush3.bf16.msra.mxu0 %v3474_v44  ;;  %v3444_v44 = vpack.c.bf16 %v1163_v1, %v1160_v0 }
 0x24b   : > { %3479 = vmatprep.subr.bf16.mxu0 %v3478_v50 }
 0x24c   : > { %3377 = vmatpush1.bf16.msra.mxu1 %v4362_v36 }
 0x24d   : > { %3379 = vmatprep.subr.bf16.mxu1 %v4368_v39 }
 0x24e   : > { %3481 = vmatpush3.bf16.msra.mxu0 %v3478_v50  ;;  %v1169_v50 = vld [vmem:[#allocation3 + $0x258] sm:$0xff] }
 0x24f   : > { %3483 = vmatprep.subr.bf16.mxu0 %v3482_v13 }
 0x250   : > { %3381 = vmatpush1.bf16.msra.mxu1 %v4372_v45 }
 0x251   : > { %3383 = vmatprep.subr.bf16.mxu1 %v4378_v48 }
 0x252   : > { %3485 = vmatpush3.bf16.msra.mxu0 %v3482_v13  ;;  %v3448_v13 = vpack.c.bf16 %v1169_v50, %v1166_v35 }
 0x253   : > { %3487 = vmatprep.subr.bf16.mxu0 %v3486_v9 }
 0x254   : > { %3385 = vmatpush1.bf16.msra.mxu1 %v4382_v54 }
 0x255   : > { %3387 = vmatprep.subr.bf16.mxu1 %v4388_v57 }
 0x256   : > { %3489 = vmatpush3.bf16.msra.mxu0 %v3486_v9 }
 0x258   : > { %3389 = vmatpush1.bf16.msra.mxu1 %v4392_v63 }
 0x259   : > { %3391 = vmatprep.subr.bf16.mxu1 %v4398_v5 }
 0x25c   : > { %3393 = vmatpush1.bf16.msra.mxu1 %v4402_v12 }
 0x25d   : > { %3395 = vmatprep.subr.bf16.mxu1 %v4408_v19 }
 0x260   : > { %3397 = vmatpush1.bf16.msra.mxu1 %v4412_v27 }
 0x261   : > { %3431 = vmatprep.subr.bf16.mxu1 %v3430_v58  ;;  %v1175_v58 = vld [vmem:[#allocation3 + $0x288] sm:$0xff] }
 0x262   : > { %v3452_v40 = vpack.c.bf16 %v1175_v58, %v1172_v55 }
 0x263   : > { %1054 = vmatmul.mubr.f32.vlgmr.msra.gmra.mrb[8].mxu1 %v4468_v10 }
 0x264   : > { %1059 = vmatprep.mubr.f32.mxu1 %v4137_v33  ;;  %3433 = vmatpush1.bf16.msra.mxu1 %v3432_v62  ;;  %v1178_v62 = vld [vmem:[#allocation3 + $0x2a0] sm:$0xff] }
 0x265   : > { %3435 = vmatprep.subr.bf16.mxu1 %v3434_v31  ;;  %v1181_v31 = vld [vmem:[#allocation3 + $0x2b8] sm:$0xff] }
 0x266   : > { %v3456_v60 = vpack.c.bf16 %v1181_v31, %v1178_v62 }
 0x267   : > { %1060 = vmatmul.mubr.f32.gmra.mrb[10].mxu1 %v4472_v22 }
 0x268   : > { %3437 = vmatpush1.bf16.msra.mxu1 %v3436_v30  ;;  %1254 = vmatprep.mubr.f32.mxu1 %v4137_v33  ;;  %v1185_v30 = vld [vmem:[#allocation3 + $0x2d8] sm:$0xff] }
 0x269   : > { %3439 = vmatprep.subr.bf16.mxu1 %v3438_v11  ;;  %v1188_v11 = vld [vmem:[#allocation3 + $0x2f0] sm:$0xff] }
 0x26a   : > { %v3458_v16 = vpack.c.bf16 %v1188_v11, %v1185_v30 }
 0x26c   : > { %3441 = vmatpush1.bf16.msra.mxu1 %v3440_v24  ;;  %v3460_v24 = vpack.c.bf16 %v1187_v20, %v1184_v59 }
 0x26d   : > { %3443 = vmatprep.subr.bf16.mxu1 %v3442_v25  ;;  %v1189_v25 = vld [vmem:[#allocation3 + $0x2f8] sm:$0xff] }
 0x26e   : > { %v3490_v0 = vpack.c.bf16 %v1189_v25, %v1186_v23 }
 0x270   : > { %3445 = vmatpush1.bf16.msra.mxu1 %v3444_v44  ;;  %3491 = vmatprep.subr.bf16.mxu0 %v3490_v0 }
 0x271   : > { %3447 = vmatprep.subr.bf16.mxu1 %v3446_v46  ;;  %3493 = vmatpush3.bf16.msra.mxu0 %v3490_v0  ;;  %v1614_v46 = vld [vmem:[#allocation3 + $0x320] sm:$0xff] }
 0x272   : > { %3499 = vmatprep.subr.bf16.mxu0 %v4332_v6 }
 0x274   : > { %3449 = vmatpush1.bf16.msra.mxu1 %v3448_v13 }
 0x275   : > { %3451 = vmatprep.subr.bf16.mxu1 %v3450_v53 }
 0x278   : > { %3453 = vmatpush1.bf16.msra.mxu1 %v3452_v40 }
 0x279   : > { %3455 = vmatprep.subr.bf16.mxu1 %v3454_v43 }
 0x27c   : > { %3457 = vmatpush1.bf16.msra.mxu1 %v3456_v60 }
 0x27d   : > { %3459 = vmatprep.subr.bf16.mxu1 %v3458_v16 }
 0x280   : > { %3461 = vmatpush1.bf16.msra.mxu1 %v3460_v24 }
 0x310   : > { %v2998_v1 = vpop.f32.mrb[4].mxu0 }
 0x311   : > { %v1132_v32 = vpop.f32.mrb[5].mxu0  ;;  %v1138_v25 = vadd.f32 %v2998_v1, %v4459_v34  ;;  %v1620_v1 = vld [vmem:[#allocation3 + $0x350] sm:$0xff] }
 0x312   : > { %v1133_v16 = vadd.f32 %v1132_v32, %v4459_v34 }
 0x316   : > { %v2963_v41 = vpop.f32.mrb[6].mxu1 }
 0x317   : > { %v980_v44 = vpop.f32.mrb[7].mxu1 }
 0x318   : > { %1255 = vmatmul.mubr.f32.vlgmr.msra.gmra.mrb[8].mxu1 %v980_v44  ;;  %3031 = vmatprep.mubr.f32.mxu0 %v980_v44 }
 0x319   : > { %3032 = vmatmul.mubr.f32.vlgmr.msra.gmra.mrb[6].mxu0 %v2963_v41  ;;  %1260 = vmatprep.mubr.f32.mxu1 %v4137_v33 }
 0x31a   : > { %3501 = vmatpush1.bf16.msra.mxu0 %v4337_v14  ;;  %1521 = vmatprep.mubr.f32.mxu0 %v4137_v33 }
 0x31b   : > { %3503 = vmatprep.subr.bf16.mxu0 %v4342_v17 }
 0x31c   : > { %1261 = vmatmul.mubr.f32.gmra.mrb[10].mxu1 %v2963_v41 }
 0x31d   : > { %3038 = vmatprep.mubr.msk.f32.mxu1 %vm440_vm0, %v4325_v2  ;;  %v1611_v2 = vld [vmem:[#allocation3 + $0x308] sm:$0xff] }
 0x31e   : > { %3505 = vmatpush1.bf16.msra.mxu0 %v4351_v26  ;;  %v3562_v35 = vpack.c.bf16 %v1614_v46, %v1611_v2 }
 0x31f   : > { %3507 = vmatprep.subr.bf16.mxu0 %v4357_v29 }
 0x322   : > { %3509 = vmatpush1.bf16.msra.mxu0 %v4362_v36 }
 0x323   : > { %3511 = vmatprep.subr.bf16.mxu0 %v4368_v39 }
 0x326   : > { %3513 = vmatpush1.bf16.msra.mxu0 %v4372_v45 }
 0x327   : > { %3515 = vmatprep.subr.bf16.mxu0 %v4378_v48 }
 0x32a   : > { %3517 = vmatpush1.bf16.msra.mxu0 %v4382_v54 }
 0x32b   : > { %3519 = vmatprep.subr.bf16.mxu0 %v4388_v57 }
 0x32e   : > { %3521 = vmatpush1.bf16.msra.mxu0 %v4392_v63 }
 0x32f   : > { %3523 = vmatprep.subr.bf16.mxu0 %v4398_v5 }
 0x332   : > { %3525 = vmatpush1.bf16.msra.mxu0 %v4402_v12 }
 0x333   : > { %3527 = vmatprep.subr.bf16.mxu0 %v4408_v19 }
 0x336   : > { %3529 = vmatpush1.bf16.msra.mxu0 %v4412_v27 }
 0x337   : > { %3563 = vmatprep.subr.bf16.mxu0 %v3562_v35 }
 0x3eb   : > { %v1256_v50 = vpop.f32.mrb[8].mxu1 }
 0x3ec   : > { %v3802_v51 = vadd.f32 %v4451_v49, %v1256_v50  ;;  %v1258_v52 = vpop.f32.mrb[9].mxu1  ;;  %v3033_v13 = vpop.f32.mrb[6].mxu0 }
 0x3ed   : > { %v1333_v53 = vpop.f32.mrb[7].mxu0  ;;  %v3804_v43 = vadd.f32 %v4454_v3, %v1258_v52  ;;  %v1339_v2 = vadd.f32 %v3033_v13, %v4461_v37  ;;  %v1610_v52 = vld [vmem:[#allocation3 + $0x300] sm:$0xff] }
 0x3ee   : > { %v2675_v55 = vmul.f32 -1.442695, %v3802_v51  ;;  %v1334_v20 = vadd.f32 %v1333_v53, %v4461_v37  ;;  %v1613_v53 = vld [vmem:[#allocation3 + $0x318] sm:$0xff] }
 0x3ef   : > { %v1262_v58 = vpop.f32.mrb[10].mxu1  ;;  %v2676_v62 = vmul.f32 -1.442695, %v3804_v43 }
 0x3f0   : > { %3929 = vpow2.f32 %v2675_v55  ;;  %v3806_v40 = vadd.f32 %v4451_v49, %v1262_v58  ;;  %v1264_v61 = vpop.f32.mrb[11].mxu1  ;;  %v1617_v58 = vld [vmem:[#allocation3 + $0x338] sm:$0xff] }
 0x3f1   : > { %v3808_v31 = vadd.f32 %v4454_v3, %v1264_v61 }
 0x3f2   : > { %v2677_v42 = vmul.f32 -1.442695, %v3806_v40 }
 0x3f3   : > { %v2678_v8 = vmul.f32 -1.442695, %v3808_v31  ;;  %v1616_v31 = vld [vmem:[#allocation3 + $0x330] sm:$0xff] }
 0x3f4   : > { %3931 = vpow2.f32 %v2677_v42  ;;  %v3564_v42 = vpack.c.bf16 %v1613_v53, %v1610_v52  ;;  %v1637_v52 = vld [vmem:[#allocation3 + $0x3d8] sm:$0xff] }
 0x3f5   : > { %3933 = vpow2.f32 %v2676_v62  ;;  %v3566_v62 = vpack.c.bf16 %v1620_v1, %v1617_v58  ;;  %v1641_v53 = vld [vmem:[#allocation3 + $0x3f8] sm:$0xff] }
 0x3fa   : > { %v3930_v7 = vpop.eup %3929 }
 0x3fb   : > { %v1358_v60 = vadd.f32 1.0, %v3930_v7  ;;  %v1619_v7 = vld [vmem:[#allocation3 + $0x348] sm:$0xff] }
 0x3fd   : > { %3935 = vrcp.f32 %v1358_v60 }
 0x3fe   : > { %v3932_v9 = vpop.eup %3931  ;;  %3937 = vpow2.f32 %v2678_v8  ;;  %v1623_v8 = vld [vmem:[#allocation3 + $0x368] sm:$0xff] }
 0x3ff   : > { %v1360_v30 = vadd.f32 1.0, %v3932_v9  ;;  %v3934_v11 = vpop.eup %3933  ;;  %v1626_v9 = vld [vmem:[#allocation3 + $0x380] sm:$0xff] }
 0x400   : > { %v1359_v0 = vadd.f32 1.0, %v3934_v11 }
 0x401   : > { %3939 = vrcp.f32 %v1360_v30  ;;  %v3568_v30 = vpack.c.bf16 %v1619_v7, %v1616_v31  ;;  %v1646_v7 = vld [vmem:[#allocation3 + $0x420] sm:$0xff] }
 0x407   : > { %v3936_v59 = vpop.eup %3935 }
 0x408   : > { %v1370_v23 = vmul.f32 %v3936_v59, %v1133_v16  ;;  %v3938_v24 = vpop.eup %3937  ;;  %v3570_v16 = vpack.c.bf16 %v1626_v9, %v1623_v8  ;;  %v1622_v59 = vld [vmem:[#allocation3 + $0x360] sm:$0xff]  ;;  %v1653_v8 = vld [vmem:[#allocation3 + $0x458] sm:$0xff]  ;;  %v1656_v9 = vld [vmem:[#allocation3 + $0x470] sm:$0xff] }
 0x409   : > { %v1361_v50 = vadd.f32 1.0, %v3938_v24 }
 0x40a   : > { %v1372_v41 = vadd.f32 %v1370_v23, %v1334_v20  ;;  %v1625_v20 = vld [vmem:[#allocation3 + $0x378] sm:$0xff]  ;;  %v1632_v23 = vld [vmem:[#allocation3 + $0x3b0] sm:$0xff] }
 0x40b   : > { %v3940_v44 = vpop.eup %3939 }
 0x40c   : > { %3941 = vtanh.f32 %v1372_v41  ;;  %v1371_v46 = vmul.f32 %v3940_v44, %v1138_v25  ;;  %v3572_v25 = vpack.c.bf16 %v1625_v20, %v1622_v59  ;;  %v1628_v41 = vld [vmem:[#allocation3 + $0x390] sm:$0xff]  ;;  %v1631_v44 = vld [vmem:[#allocation3 + $0x3a8] sm:$0xff] }
 0x40d   : > { %3943 = vrcp.f32 %v1359_v0  ;;  %v1655_v59 = vld [vmem:[#allocation3 + $0x468] sm:$0xff] }
 0x40e   : > { %v1373_v35 = vadd.f32 %v1371_v46, %v1339_v2  ;;  %v1635_v2 = vld [vmem:[#allocation3 + $0x3c8] sm:$0xff]  ;;  %v1638_v46 = vld [vmem:[#allocation3 + $0x3e0] sm:$0xff] }
 0x410   : > { %3945 = vtanh.f32 %v1373_v35  ;;  %v3576_v35 = vpack.c.bf16 %v1631_v44, %v1628_v41  ;;  %v1624_v44 = vld [vmem:[#allocation3 + $0x370] sm:$0xff] }
 0x411   : > { %3947 = vrcp.f32 %v1361_v50  ;;  %v4543_v50 = vld [vmem:[%s4318_s27 + $0x8] sm:$0xff] }
 0x416   : > { %v3942_v32 = vpop.eup %3941 }
 0x417   : > { %v1376_v51 = vsub.f32 %v4468_v10, %v3942_v32  ;;  %v3944_v55 = vpop.eup %3943 }
 0x419   : > { %v1378_v40 = vmul.f32 %v3944_v55, %v1376_v51  ;;  %v1634_v51 = vld [vmem:[#allocation3 + $0x3c0] sm:$0xff]  ;;  %v1644_v55 = vld [vmem:[#allocation3 + $0x410] sm:$0xff] }
 0x41a   : > { %v3946_v61 = vpop.eup %3945  ;;  %v3580_v58 = vpack.c.bf16 %v1637_v52, %v1634_v51  ;;  %v3582_v1 = vpack.c.bf16 %v1644_v55, %v1641_v53  ;;  %v1636_v51 = vld [vmem:[#allocation3 + $0x3d0] sm:$0xff]  ;;  %v1639_v52 = vld [vmem:[#allocation3 + $0x3e8] sm:$0xff]  ;;  %v1642_v55 = vld [vmem:[#allocation3 + $0x400] sm:$0xff] }
 0x41b   : > { %v4530_v43 = vadd.f32 %v3942_v32, %v1378_v40  ;;  %v1377_v13 = vsub.f32 %v4472_v22, %v3946_v61  ;;  %v3948_v60 = vpop.eup %3947  ;;  %v1629_v22 = vld [vmem:[#allocation3 + $0x398] sm:$0xff]  ;;  %v3578_v32 = vpack.c.bf16 %v1638_v46, %v1635_v2  ;;  %v1640_v40 = vld [vmem:[#allocation3 + $0x3f0] sm:$0xff]  ;;  %v1627_v2 = vld [vmem:[#allocation3 + $0x388] sm:$0xff]  ;;  %v3610_v53 = vpack.c.bf16 %v1639_v52, %v1636_v51 }
 0x41c   : > { %v3574_v0 = vpack.c.bf16 %v1632_v23, %v1629_v22  ;;  %v1612_v22 = vld [vmem:[#allocation3 + $0x310] sm:$0xff]  ;;  %v1615_v23 = vld [vmem:[#allocation3 + $0x328] sm:$0xff]  ;;  %v1630_v46 = vld [vmem:[#allocation3 + $0x3a0] sm:$0xff] }
 0x41d   : > { %1522 = vmatmul.mubr.f32.vlgmr.msra.gmra.mrb[8].mxu0 %v4530_v43  ;;  %v1379_v10 = vmul.f32 %v3948_v60, %v1377_v13  ;;  %v1650_v13 = vld [vmem:[#allocation3 + $0x440] sm:$0xff]  ;;  %v1649_v60 = vld [vmem:[#allocation3 + $0x438] sm:$0xff] }
 0x41e   : > { %1527 = vmatprep.mubr.f32.mxu0 %v4137_v33  ;;  %3565 = vmatpush1.bf16.msra.mxu0 %v3564_v42  ;;  %v1647_v42 = vld [vmem:[#allocation3 + $0x428] sm:$0xff] }
 0x41f   : > { %v4535_v11 = vadd.f32 %v3946_v61, %v1379_v10  ;;  %3567 = vmatprep.subr.bf16.mxu0 %v3566_v62  ;;  %v1643_v61 = vld [vmem:[#allocation3 + $0x408] sm:$0xff]  ;;  %v3586_v31 = vpack.c.bf16 %v1650_v13, %v1647_v42  ;;  %v3588_v10 = vpack.c.bf16 %v1649_v60, %v1646_v7  ;;  %v1654_v13 = vld [vmem:[#allocation3 + $0x460] sm:$0xff] }
 0x420   : > { %v3584_v62 = vpack.c.bf16 %v1643_v61, %v1640_v40  ;;  %v1648_v40 = vld [vmem:[#allocation3 + $0x430] sm:$0xff]  ;;  %v1651_v61 = vld [vmem:[#allocation3 + $0x448] sm:$0xff] }
 0x421   : > { %1528 = vmatmul.mubr.f32.gmra.mrb[10].mxu0 %v4535_v11  ;;  %v3494_v24 = vpack.c.bf16 %v4535_v11, %v4530_v43  ;;  %v3618_v42 = vpack.c.bf16 %v1651_v61, %v1648_v40  ;;  %v2078_v40 = vld [vmem:[#allocation3 + $0x480] sm:$0xff]  ;;  %v2081_v61 = vld [vmem:[#allocation3 + $0x498] sm:$0xff] }
 0x422   : > { %3569 = vmatpush1.bf16.msra.mxu0 %v3568_v30  ;;  %1722 = vmatprep.mubr.f32.mxu0 %v4137_v33  ;;  %v3590_v30 = vpack.c.bf16 %v1656_v9, %v1653_v8  ;;  %v4004_v8 = vld [vmem:[%s4318_s27] sm:$0xff]  ;;  %s2554_s27 = scalar_lea.sflag [#allocation5], %s342_s21 }
 0x423   : > { %3495 = vmatprep.subr.bf16.mxu1 %v3494_v24  ;;  %3571 = vmatprep.subr.bf16.mxu0 %v3570_v16  ;;  %v1652_v16 = vld [vmem:[#allocation3 + $0x450] sm:$0xff] }
 0x424   : > { %3497 = vmatpush3.bf16.msra.mxu1 %v3494_v24  ;;  %v3592_v20 = vpack.c.bf16 %v1655_v59, %v1652_v16  ;;  %v3594_v24 = vpack.c.bf16 %v1615_v23, %v1612_v22 }
 0x425   : > { %3531 = vmatprep.subr.bf16.mxu1 %v4339_v15 }
 0x426   : > { %3573 = vmatpush1.bf16.msra.mxu0 %v3572_v25  ;;  %v1618_v25 = vld [vmem:[#allocation3 + $0x340] sm:$0xff] }
 0x427   : > { %3039 = vmatmul.mubr.msk.f32.vlgmr.msra.gmra.mrb[12].mxu1 %vm440_vm0, %v4543_v50  ;;  %3575 = vmatprep.subr.bf16.mxu0 %v3574_v0  ;;  %v1621_v0 = vld [vmem:[#allocation3 + $0x358] sm:$0xff] }
 0x428   : > { %3533 = vmatpush3.bf16.msra.mxu1 %v4339_v15  ;;  %3073 = vmatprep.mubr.f32.mxu1 %v4530_v43  ;;  %v3598_v41 = vpack.c.bf16 %v1621_v0, %v1618_v25 }
 0x429   : > { %3535 = vmatprep.subr.bf16.mxu1 %v4345_v21 }
 0x42a   : > { %3577 = vmatpush1.bf16.msra.mxu0 %v3576_v35  ;;  %v1633_v35 = vld [vmem:[#allocation3 + $0x3b8] sm:$0xff] }
 0x42b   : > { %3579 = vmatprep.subr.bf16.mxu0 %v3578_v32  ;;  %v3606_v32 = vpack.c.bf16 %v1633_v35, %v1630_v46 }
 0x42c   : > { %3537 = vmatpush3.bf16.msra.mxu1 %v4345_v21 }
 0x42d   : > { %3539 = vmatprep.subr.bf16.mxu1 %v4354_v28 }
 0x42e   : > { %3581 = vmatpush1.bf16.msra.mxu0 %v3580_v58  ;;  %v1645_v58 = vld [vmem:[#allocation3 + $0x418] sm:$0xff] }
 0x42f   : > { %3583 = vmatprep.subr.bf16.mxu0 %v3582_v1  ;;  %v3614_v1 = vpack.c.bf16 %v1645_v58, %v1642_v55 }
 0x430   : > { %3541 = vmatpush3.bf16.msra.mxu1 %v4354_v28 }
 0x431   : > { %3543 = vmatprep.subr.bf16.mxu1 %v4365_v38 }
 0x432   : > { %3585 = vmatpush1.bf16.msra.mxu0 %v3584_v62  ;;  %v1657_v62 = vld [vmem:[#allocation3 + $0x478] sm:$0xff] }
 0x433   : > { %3587 = vmatprep.subr.bf16.mxu0 %v3586_v31  ;;  %v3622_v31 = vpack.c.bf16 %v1657_v62, %v1654_v13  ;;  %v2085_v13 = vld [vmem:[#allocation3 + $0x4b8] sm:$0xff]  ;;  %v2088_v62 = vld [vmem:[#allocation3 + $0x4d0] sm:$0xff] }
 0x434   : > { %3545 = vmatpush3.bf16.msra.mxu1 %v4365_v38 }
 0x435   : > { %3547 = vmatprep.subr.bf16.mxu1 %v4375_v47 }
 0x436   : > { %3589 = vmatpush1.bf16.msra.mxu0 %v3588_v10 }
 0x437   : > { %3591 = vmatprep.subr.bf16.mxu0 %v3590_v30 }
 0x438   : > { %3549 = vmatpush3.bf16.msra.mxu1 %v4375_v47 }
 0x439   : > { %3551 = vmatprep.subr.bf16.mxu1 %v4385_v56 }
 0x43a   : > { %3593 = vmatpush1.bf16.msra.mxu0 %v3592_v20 }
 0x43b   : > { %3631 = vmatprep.subr.bf16.mxu0 %v4332_v6  ;;  %v3602_v6 = vpack.c.bf16 %v1627_v2, %v1624_v44 }
 0x43c   : > { %3553 = vmatpush3.bf16.msra.mxu1 %v4385_v56 }
 0x43d   : > { %3555 = vmatprep.subr.bf16.mxu1 %v4395_v4 }
 0x440   : > { %3557 = vmatpush3.bf16.msra.mxu1 %v4395_v4 }
 0x441   : > { %3559 = vmatprep.subr.bf16.mxu1 %v4405_v18 }
 0x444   : > { %3561 = vmatpush3.bf16.msra.mxu1 %v4405_v18 }
 0x445   : > { %3595 = vmatprep.subr.bf16.mxu1 %v3594_v24 }
 0x447   : > { %3074 = vmatmul.mubr.f32.vlgmr.msra.gmra.mrb[14].mxu1 %v4535_v11 }
 0x448   : > { %3597 = vmatpush3.bf16.msra.mxu1 %v3594_v24 }
 0x449   : > { %3599 = vmatprep.subr.bf16.mxu1 %v3598_v41 }
 0x44c   : > { %3601 = vmatpush3.bf16.msra.mxu1 %v3598_v41 }
 0x44d   : > { %3603 = vmatprep.subr.bf16.mxu1 %v3602_v6 }
 0x450   : > { %3605 = vmatpush3.bf16.msra.mxu1 %v3602_v6 }
 0x451   : > { %3607 = vmatprep.subr.bf16.mxu1 %v3606_v32 }
 0x454   : > { %3609 = vmatpush3.bf16.msra.mxu1 %v3606_v32 }
 0x455   : > { %3611 = vmatprep.subr.bf16.mxu1 %v3610_v53 }
 0x458   : > { %3613 = vmatpush3.bf16.msra.mxu1 %v3610_v53 }
 0x459   : > { %3615 = vmatprep.subr.bf16.mxu1 %v3614_v1 }
 0x45c   : > { %3617 = vmatpush3.bf16.msra.mxu1 %v3614_v1 }
 0x45d   : > { %3619 = vmatprep.subr.bf16.mxu1 %v3618_v42 }
 0x460   : > { %3621 = vmatpush3.bf16.msra.mxu1 %v3618_v42 }
 0x461   : > { %3623 = vmatprep.subr.bf16.mxu1 %v3622_v31 }
 0x464   : > { %3625 = vmatpush3.bf16.msra.mxu1 %v3622_v31 }
 0x4fa   : > { %v3040_v7 = vpop.f32.mrb[12].mxu1 }
 0x4fb   : > { %v1448_v60 = vpop.f32.mrb[13].mxu1 }
 0x4fc   : > { %1723 = vmatmul.mubr.f32.vlgmr.msra.gmra.mrb[8].mxu0 %v1448_v60  ;;  %3108 = vmatprep.mubr.f32.mxu1 %v1448_v60  ;;  %v3696_v60 = vpack.c.bf16 %v2081_v61, %v2078_v40  ;;  %v2083_v61 = vld [vmem:[#allocation3 + $0x4a8] sm:$0xff] }
 0x4fd   : > { %3109 = vmatmul.mubr.f32.vlgmr.msra.gmra.mrb[16].mxu1 %v3040_v7  ;;  %1728 = vmatprep.mubr.f32.mxu0 %v4137_v33 }
 0x4fe   : > { %3633 = vmatpush1.bf16.msra.mxu0 %v4337_v14  ;;  %3115 = vmatprep.mubr.msk.f32.mxu1 %vm440_vm0, %v4004_v8 }
 0x4ff   : > { %3635 = vmatprep.subr.bf16.mxu0 %v4342_v17 }
 0x500   : > { %1729 = vmatmul.mubr.f32.gmra.mrb[10].mxu0 %v3040_v7 }
 0x501   : > { %1989 = vmatprep.mubr.f32.mxu0 %v4137_v33 }
 0x502   : > { %3637 = vmatpush1.bf16.msra.mxu0 %v4351_v26  ;;  %v2079_v26 = vld [vmem:[#allocation3 + $0x488] sm:$0xff] }
 0x503   : > { %3639 = vmatprep.subr.bf16.mxu0 %v4357_v29  ;;  %v2082_v29 = vld [vmem:[#allocation3 + $0x4a0] sm:$0xff] }
 0x506   : > { %3641 = vmatpush1.bf16.msra.mxu0 %v4362_v36  ;;  %v3694_v36 = vpack.c.bf16 %v2082_v29, %v2079_v26  ;;  %v2084_v26 = vld [vmem:[#allocation3 + $0x4b0] sm:$0xff]  ;;  %v2087_v29 = vld [vmem:[#allocation3 + $0x4c8] sm:$0xff] }
 0x507   : > { %3643 = vmatprep.subr.bf16.mxu0 %v4368_v39 }
 0x50a   : > { %3645 = vmatpush1.bf16.msra.mxu0 %v4372_v45 }
 0x50b   : > { %3647 = vmatprep.subr.bf16.mxu0 %v4378_v48 }
 0x50e   : > { %3649 = vmatpush1.bf16.msra.mxu0 %v4382_v54 }
 0x50f   : > { %3651 = vmatprep.subr.bf16.mxu0 %v4388_v57 }
 0x512   : > { %3653 = vmatpush1.bf16.msra.mxu0 %v4392_v63 }
 0x513   : > { %3655 = vmatprep.subr.bf16.mxu0 %v4398_v5 }
 0x516   : > { %3657 = vmatpush1.bf16.msra.mxu0 %v4402_v12 }
 0x517   : > { %3659 = vmatprep.subr.bf16.mxu0 %v4408_v19 }
 0x51a   : > { %v3075_v14 = vpop.f32.mrb[14].mxu1  ;;  %3661 = vmatpush1.bf16.msra.mxu0 %v4412_v27 }
 0x51b   : > { %v1600_v17 = vpop.f32.mrb[15].mxu1  ;;  %3695 = vmatprep.subr.bf16.mxu0 %v3694_v36  ;;  %v1606_v6 = vadd.f32 %v3075_v14, %v4459_v34 }
 0x51c   : > { %v1601_v25 = vadd.f32 %v1600_v17, %v4459_v34  ;;  %v3698_v17 = vpack.c.bf16 %v2088_v62, %v2085_v13  ;;  %v2089_v13 = vld [vmem:[#allocation3 + $0x4d8] sm:$0xff]  ;;  %v2092_v62 = vld [vmem:[#allocation3 + $0x4f0] sm:$0xff] }
 0x5cf   : > { %v1724_v39 = vpop.f32.mrb[8].mxu0 }
 0x5d0   : > { %v3810_v45 = vadd.f32 %v4451_v49, %v1724_v39  ;;  %v1726_v48 = vpop.f32.mrb[9].mxu0  ;;  %v3110_v54 = vpop.f32.mrb[16].mxu1  ;;  %v2091_v39 = vld [vmem:[#allocation3 + $0x4e8] sm:$0xff] }
 0x5d1   : > { %v1801_v57 = vpop.f32.mrb[17].mxu1  ;;  %v3812_v27 = vadd.f32 %v4454_v3, %v1726_v48  ;;  %v1807_v51 = vadd.f32 %v3110_v54, %v4461_v37  ;;  %v3700_v48 = vpack.c.bf16 %v2087_v29, %v2084_v26  ;;  %v2113_v29 = vld [vmem:[#allocation3 + $0x598] sm:$0xff] }
 0x5d2   : > { %v2681_v63 = vmul.f32 -1.442695, %v3810_v45  ;;  %v1802_v41 = vadd.f32 %v1801_v57, %v4461_v37  ;;  %v2094_v45 = vld [vmem:[#allocation3 + $0x500] sm:$0xff] }
 0x5d3   : > { %v1730_v5 = vpop.f32.mrb[10].mxu0  ;;  %v2682_v10 = vmul.f32 -1.442695, %v3812_v27  ;;  %v3702_v57 = vpack.c.bf16 %v2094_v45, %v2091_v39  ;;  %v2116_v39 = vld [vmem:[#allocation3 + $0x5b0] sm:$0xff]  ;;  %v2119_v45 = vld [vmem:[#allocation3 + $0x5c8] sm:$0xff] }
 0x5d4   : > { %3949 = vpow2.f32 %v2681_v63  ;;  %v3814_v12 = vadd.f32 %v4451_v49, %v1730_v5  ;;  %v1732_v19 = vpop.f32.mrb[11].mxu0  ;;  %v2090_v63 = vld [vmem:[#allocation3 + $0x4e0] sm:$0xff]  ;;  %v2093_v5 = vld [vmem:[#allocation3 + $0x4f8] sm:$0xff] }
 0x5d5   : > { %v3816_v30 = vadd.f32 %v4454_v3, %v1732_v19 }
 0x5d6   : > { %v2683_v9 = vmul.f32 -1.442695, %v3814_v12  ;;  %v2100_v12 = vld [vmem:[#allocation3 + $0x530] sm:$0xff] }
 0x5d7   : > { %v2684_v20 = vmul.f32 -1.442695, %v3816_v30  ;;  %v2099_v30 = vld [vmem:[#allocation3 + $0x528] sm:$0xff] }
 0x5d8   : > { %3951 = vpow2.f32 %v2683_v9  ;;  %v3704_v9 = vpack.c.bf16 %v2093_v5, %v2090_v63 }
 0x5d9   : > { %3953 = vpow2.f32 %v2682_v10  ;;  %v2096_v10 = vld [vmem:[#allocation3 + $0x510] sm:$0xff] }
 0x5de   : > { %v3950_v16 = vpop.eup %3949 }
 0x5df   : > { %v1826_v59 = vadd.f32 1.0, %v3950_v16  ;;  %v2103_v16 = vld [vmem:[#allocation3 + $0x548] sm:$0xff] }
 0x5e1   : > { %3955 = vrcp.f32 %v1826_v59  ;;  %v2106_v59 = vld [vmem:[#allocation3 + $0x560] sm:$0xff] }
 0x5e2   : > { %v3952_v22 = vpop.eup %3951  ;;  %3957 = vpow2.f32 %v2684_v20  ;;  %v3708_v20 = vpack.c.bf16 %v2099_v30, %v2096_v10  ;;  %v2320_v30 = vld [vmem:[%s4744_s6 + $0x10] sm:$0xff] }
 0x5e3   : > { %v1828_v23 = vadd.f32 1.0, %v3952_v22  ;;  %v3954_v24 = vpop.eup %3953  ;;  %v3710_v22 = vpack.c.bf16 %v2106_v59, %v2103_v16  ;;  %v2321_v16 = vld [vmem:[%s4744_s6 + $0x18] sm:$0xff] }
 0x5e4   : > { %v1827_v46 = vadd.f32 1.0, %v3954_v24  ;;  %v2105_v24 = vld [vmem:[#allocation3 + $0x558] sm:$0xff]  ;;  %v3762_v59 = vpack.c.bf16 %v2321_v16, %v2320_v30 }
 0x5e5   : > { %3959 = vrcp.f32 %v1828_v23  ;;  %v2102_v23 = vld [vmem:[#allocation3 + $0x540] sm:$0xff] }
 0x5eb   : > { %v3956_v0 = vpop.eup %3955 }
 0x5ec   : > { %v1838_v44 = vmul.f32 %v3956_v0, %v1601_v25  ;;  %v3958_v2 = vpop.eup %3957  ;;  %v2109_v25 = vld [vmem:[#allocation3 + $0x578] sm:$0xff]  ;;  %v2112_v0 = vld [vmem:[#allocation3 + $0x590] sm:$0xff] }
 0x5ed   : > { %v1829_v55 = vadd.f32 1.0, %v3958_v2  ;;  %v2108_v2 = vld [vmem:[#allocation3 + $0x570] sm:$0xff] }
 0x5ee   : > { %v1840_v35 = vadd.f32 %v1838_v44, %v1802_v41  ;;  %v3712_v41 = vpack.c.bf16 %v2105_v24, %v2102_v23  ;;  %v3714_v44 = vpack.c.bf16 %v2112_v0, %v2109_v25  ;;  %v2324_v24 = vld [vmem:[%s4744_s6 + $0x30] sm:$0xff]  ;;  %v2325_v25 = vld [vmem:[%s4744_s6 + $0x38] sm:$0xff] }
 0x5ef   : > { %v3960_v32 = vpop.eup %3959  ;;  %v3770_v0 = vpack.c.bf16 %v2325_v25, %v2324_v24 }
 0x5f0   : > { %3961 = vtanh.f32 %v1840_v35  ;;  %v1839_v52 = vmul.f32 %v3960_v32, %v1606_v6  ;;  %v2111_v6 = vld [vmem:[#allocation3 + $0x588] sm:$0xff]  ;;  %v2114_v32 = vld [vmem:[#allocation3 + $0x5a0] sm:$0xff] }
 0x5f1   : > { %3963 = vrcp.f32 %v1827_v46  ;;  %v2118_v46 = vld [vmem:[#allocation3 + $0x5c0] sm:$0xff] }
 0x5f2   : > { %v1841_v53 = vadd.f32 %v1839_v52, %v1807_v51  ;;  %v2117_v51 = vld [vmem:[#allocation3 + $0x5b8] sm:$0xff] }
 0x5f3   : > { %v2121_v52 = vld [vmem:[#allocation3 + $0x5d8] sm:$0xff] }
 0x5f4   : > { %3965 = vtanh.f32 %v1841_v53  ;;  %v2124_v53 = vld [vmem:[#allocation3 + $0x5f0] sm:$0xff] }
 0x5f5   : > { %3967 = vrcp.f32 %v1829_v55  ;;  %v3720_v55 = vpack.c.bf16 %v2117_v51, %v2114_v32  ;;  %v2332_v51 = vld [vmem:[%s4744_s6 + $0x70] sm:$0xff] }
 0x5fa   : > { %v3962_v58 = vpop.eup %3961 }
 0x5fb   : > { %v1844_v1 = vsub.f32 %v4530_v43, %v3962_v58  ;;  %v3964_v42 = vpop.eup %3963 }
 0x5fd   : > { %v1846_v31 = vmul.f32 %v3964_v42, %v1844_v1  ;;  %v2123_v1 = vld [vmem:[#allocation3 + $0x5e8] sm:$0xff]  ;;  %v2086_v42 = vld [vmem:[#allocation3 + $0x4c0] sm:$0xff] }
 0x5fe   : > { %v3966_v7 = vpop.eup %3965 }
 0x5ff   : > { %v4593_v8 = vadd.f32 %v3962_v58, %v1846_v31  ;;  %v1845_v14 = vsub.f32 %v4535_v11, %v3966_v7  ;;  %v3968_v36 = vpop.eup %3967  ;;  %v2097_v11 = vld [vmem:[#allocation3 + $0x518] sm:$0xff]  ;;  %v2120_v58 = vld [vmem:[#allocation3 + $0x5d0] sm:$0xff]  ;;  %v2095_v31 = vld [vmem:[#allocation3 + $0x508] sm:$0xff] }
 0x600   : > { %v3706_v27 = vpack.c.bf16 %v2100_v12, %v2097_v11  ;;  %v3724_v40 = vpack.c.bf16 %v2123_v1, %v2120_v58 }
 0x601   : > { %1990 = vmatmul.mubr.f32.vlgmr.msra.gmra.mrb[12].mxu0 %v4593_v8  ;;  %v1847_v43 = vmul.f32 %v3968_v36, %v1845_v14  ;;  %v2104_v14 = vld [vmem:[#allocation3 + $0x550] sm:$0xff] }
 0x602   : > { %1995 = vmatprep.mubr.f32.mxu0 %v4137_v33  ;;  %3697 = vmatpush1.bf16.msra.mxu0 %v3696_v60  ;;  %v2101_v60 = vld [vmem:[#allocation3 + $0x538] sm:$0xff] }
 0x603   : > { %v4598_v54 = vadd.f32 %v3966_v7, %v1847_v43  ;;  %3699 = vmatprep.subr.bf16.mxu0 %v3698_v17  ;;  %v2098_v7 = vld [vmem:[#allocation3 + $0x520] sm:$0xff]  ;;  %v2107_v17 = vld [vmem:[#allocation3 + $0x568] sm:$0xff]  ;;  %v3750_v43 = vpack.c.bf16 %v2119_v45, %v2116_v39 }
 0x604   : > { %v3742_v26 = vpack.c.bf16 %v2107_v17, %v2104_v14 }
 0x605   : > { %1996 = vmatmul.mubr.f32.gmra.mrb[14].mxu0 %v4598_v54  ;;  %v3626_v19 = vpack.c.bf16 %v4598_v54, %v4593_v8 }
 0x606   : > { %3701 = vmatpush1.bf16.msra.mxu0 %v3700_v48  ;;  %2190 = vmatprep.mubr.f32.mxu0 %v4137_v33  ;;  %v2122_v48 = vld [vmem:[#allocation3 + $0x5e0] sm:$0xff] }
 0x607   : > { %3627 = vmatprep.subr.bf16.mxu1 %v3626_v19  ;;  %3703 = vmatprep.subr.bf16.mxu0 %v3702_v57  ;;  %v2125_v57 = vld [vmem:[#allocation3 + $0x5f8] sm:$0xff] }
 0x608   : > { %3629 = vmatpush3.bf16.msra.mxu1 %v3626_v19  ;;  %v3754_v63 = vpack.c.bf16 %v2125_v57, %v2122_v48 }
 0x609   : > { %3663 = vmatprep.subr.bf16.mxu1 %v4339_v15 }
 0x60a   : > { %3705 = vmatpush1.bf16.msra.mxu0 %v3704_v9  ;;  %v2318_v9 = vld [vmem:[%s4744_s6] sm:$0xff] }
 0x60b   : > { %3116 = vmatmul.mubr.msk.f32.vlgmr.msra.gmra.mrb[18].mxu1 %vm440_vm0, %v4543_v50  ;;  %3707 = vmatprep.subr.bf16.mxu0 %v3706_v27  ;;  %v2115_v50 = vld [vmem:[#allocation3 + $0x5a8] sm:$0xff] }
 0x60c   : > { %3665 = vmatpush3.bf16.msra.mxu1 %v4339_v15  ;;  %3150 = vmatprep.mubr.f32.mxu1 %v4593_v8  ;;  %v3716_v15 = vpack.c.bf16 %v2111_v6, %v2108_v2  ;;  %v3718_v35 = vpack.c.bf16 %v2118_v46, %v2115_v50  ;;  %v2319_v27 = vld [vmem:[%s4744_s6 + $0x8] sm:$0xff]  ;;  %v2328_v6 = vld [vmem:[%s4744_s6 + $0x50] sm:$0xff]  ;;  %v2329_v50 = vld [vmem:[%s4744_s6 + $0x58] sm:$0xff] }
 0x60d   : > { %3667 = vmatprep.subr.bf16.mxu1 %v4345_v21  ;;  %v3758_v10 = vpack.c.bf16 %v2319_v27, %v2318_v9  ;;  %v2330_v46 = vld [vmem:[%s4744_s6 + $0x60] sm:$0xff] }
 0x60e   : > { %3709 = vmatpush1.bf16.msra.mxu0 %v3708_v20  ;;  %v2322_v20 = vld [vmem:[%s4744_s6 + $0x20] sm:$0xff] }
 0x60f   : > { %3711 = vmatprep.subr.bf16.mxu0 %v3710_v22  ;;  %v2323_v22 = vld [vmem:[%s4744_s6 + $0x28] sm:$0xff] }
 0x610   : > { %3669 = vmatpush3.bf16.msra.mxu1 %v4345_v21  ;;  %v3722_v21 = vpack.c.bf16 %v2124_v53, %v2121_v52  ;;  %v3766_v23 = vpack.c.bf16 %v2323_v22, %v2322_v20  ;;  %v2333_v52 = vld [vmem:[%s4744_s6 + $0x78] sm:$0xff]  ;;  %v4139_v22 = vmov 0  }
 0x611   : > { %3671 = vmatprep.subr.bf16.mxu1 %v4354_v28  ;;  %v3786_v53 = vpack.c.bf16 %v2333_v52, %v2332_v51  ;;  %3907 = vset.pattern.permute.xlu1 %v4139_v22 }
 0x612   : > { %3713 = vmatpush1.bf16.msra.mxu0 %v3712_v41  ;;  %v2326_v41 = vld [vmem:[%s4744_s6 + $0x40] sm:$0xff] }
 0x613   : > { %3715 = vmatprep.subr.bf16.mxu0 %v3714_v44  ;;  %v2327_v44 = vld [vmem:[%s4744_s6 + $0x48] sm:$0xff] }
 0x614   : > { %3673 = vmatpush3.bf16.msra.mxu1 %v4354_v28  ;;  %v2080_v28 = vld [vmem:[#allocation3 + $0x490] sm:$0xff]  ;;  %v3774_v2 = vpack.c.bf16 %v2327_v44, %v2326_v41 }
 0x615   : > { %3675 = vmatprep.subr.bf16.mxu1 %v4365_v38 }
 0x616   : > { %3717 = vmatpush1.bf16.msra.mxu0 %v3716_v15  ;;  %v3778_v15 = vpack.c.bf16 %v2329_v50, %v2328_v6 }
 0x617   : > { %3719 = vmatprep.subr.bf16.mxu0 %v3718_v35  ;;  %v2331_v35 = vld [vmem:[%s4744_s6 + $0x68] sm:$0xff] }
 0x618   : > { %3677 = vmatpush3.bf16.msra.mxu1 %v4365_v38  ;;  %v3726_v38 = vpack.c.bf16 %v2083_v61, %v2080_v28  ;;  %v3782_v32 = vpack.c.bf16 %v2331_v35, %v2330_v46 }
 0x619   : > { %3679 = vmatprep.subr.bf16.mxu1 %v4375_v47 }
 0x61a   : > { %3721 = vmatpush1.bf16.msra.mxu0 %v3720_v55  ;;  %v4138_v55 = vmov 0.0|0.0  }
 0x61b   : > { %3723 = vmatprep.subr.bf16.mxu0 %v3722_v21 }
 0x61c   : > { %3681 = vmatpush3.bf16.msra.mxu1 %v4375_v47  ;;  %v3730_v47 = vpack.c.bf16 %v2089_v13, %v2086_v42 }
 0x61d   : > { %3683 = vmatprep.subr.bf16.mxu1 %v4385_v56 }
 0x61e   : > { %3725 = vmatpush1.bf16.msra.mxu0 %v3724_v40 }
 0x61f   : > { %3759 = vmatprep.subr.bf16.mxu0 %v3758_v10 }
 0x620   : > { %3685 = vmatpush3.bf16.msra.mxu1 %v4385_v56  ;;  %v3734_v56 = vpack.c.bf16 %v2095_v31, %v2092_v62 }
 0x621   : > { %3687 = vmatprep.subr.bf16.mxu1 %v4395_v4 }
 0x624   : > { %3689 = vmatpush3.bf16.msra.mxu1 %v4395_v4  ;;  %v3738_v4 = vpack.c.bf16 %v2101_v60, %v2098_v7 }
 0x625   : > { %3691 = vmatprep.subr.bf16.mxu1 %v4405_v18 }
 0x628   : > { %3693 = vmatpush3.bf16.msra.mxu1 %v4405_v18  ;;  %v2110_v18 = vld [vmem:[#allocation3 + $0x580] sm:$0xff] }
 0x629   : > { %3727 = vmatprep.subr.bf16.mxu1 %v3726_v38  ;;  %v3746_v36 = vpack.c.bf16 %v2113_v29, %v2110_v18 }
 0x62b   : > { %3151 = vmatmul.mubr.f32.vlgmr.msra.gmra.mrb[20].mxu1 %v4598_v54 }
 0x62c   : > { %3729 = vmatpush3.bf16.msra.mxu1 %v3726_v38 }
 0x62d   : > { %3731 = vmatprep.subr.bf16.mxu1 %v3730_v47 }
 0x630   : > { %3733 = vmatpush3.bf16.msra.mxu1 %v3730_v47 }
 0x631   : > { %3735 = vmatprep.subr.bf16.mxu1 %v3734_v56 }
 0x634   : > { %3737 = vmatpush3.bf16.msra.mxu1 %v3734_v56 }
 0x635   : > { %3739 = vmatprep.subr.bf16.mxu1 %v3738_v4 }
 0x638   : > { %3741 = vmatpush3.bf16.msra.mxu1 %v3738_v4 }
 0x639   : > { %3743 = vmatprep.subr.bf16.mxu1 %v3742_v26 }
 0x63c   : > { %3745 = vmatpush3.bf16.msra.mxu1 %v3742_v26 }
 0x63d   : > { %3747 = vmatprep.subr.bf16.mxu1 %v3746_v36 }
 0x640   : > { %3749 = vmatpush3.bf16.msra.mxu1 %v3746_v36 }
 0x641   : > { %3751 = vmatprep.subr.bf16.mxu1 %v3750_v43 }
 0x644   : > { %3753 = vmatpush3.bf16.msra.mxu1 %v3750_v43 }
 0x645   : > { %3755 = vmatprep.subr.bf16.mxu1 %v3754_v63 }
 0x648   : > { %3757 = vmatpush3.bf16.msra.mxu1 %v3754_v63 }
 0x649   : > { %3790 = vmatprep.subr.bf16.mxu1 %v4138_v55 }
 0x6de   : > { %v3117_v5 = vpop.f32.mrb[18].mxu1 }
 0x6df   : > { %v1916_v11 = vpop.f32.mrb[19].mxu1 }
 0x6e0   : > { %2191 = vmatmul.mubr.f32.vlgmr.msra.gmra.mrb[12].mxu0 %v1916_v11  ;;  %3185 = vmatprep.mubr.f32.mxu1 %v1916_v11 }
 0x6e1   : > { %2196 = vmatprep.mubr.f32.mxu0 %v4137_v33  ;;  %3186 = vmatmul.mubr.f32.vlgmr.msra.gmra.mrb[22].mxu1 %v3117_v5 }
 0x6e2   : > { %3761 = vmatpush3.bf16.msra.mxu0 %v3758_v10  ;;  %3227 = vmatprep.mubr.msk.f32.mxu1 %vm4140_vm1, %v4137_v33 }
 0x6e3   : > { %3763 = vmatprep.subr.bf16.mxu0 %v3762_v59 }
 0x6e4   : > { %2197 = vmatmul.mubr.f32.gmra.mrb[14].mxu0 %v3117_v5 }
 0x6e6   : > { %3765 = vmatpush3.bf16.msra.mxu0 %v3762_v59 }
 0x6e7   : > { %3767 = vmatprep.subr.bf16.mxu0 %v3766_v23 }
 0x6ea   : > { %3769 = vmatpush3.bf16.msra.mxu0 %v3766_v23 }
 0x6eb   : > { %3771 = vmatprep.subr.bf16.mxu0 %v3770_v0 }
 0x6ee   : > { %3773 = vmatpush3.bf16.msra.mxu0 %v3770_v0 }
 0x6ef   : > { %3775 = vmatprep.subr.bf16.mxu0 %v3774_v2 }
 0x6f2   : > { %3777 = vmatpush3.bf16.msra.mxu0 %v3774_v2 }
 0x6f3   : > { %3779 = vmatprep.subr.bf16.mxu0 %v3778_v15 }
 0x6f6   : > { %3781 = vmatpush3.bf16.msra.mxu0 %v3778_v15 }
 0x6f7   : > { %3783 = vmatprep.subr.bf16.mxu0 %v3782_v32 }
 0x6fa   : > { %3785 = vmatpush3.bf16.msra.mxu0 %v3782_v32 }
 0x6fb   : > { %3787 = vmatprep.subr.bf16.mxu0 %v3786_v53 }
 0x6fe   : > { %v4625_v12 = vpop.f32.mrb[20].mxu1  ;;  %3789 = vmatpush3.bf16.msra.mxu0 %v3786_v53 }
 0x6ff   : > { %v4627_v19 = vpop.f32.mrb[21].mxu1 }
 0x7b3   : > { %v2192_v21 = vpop.f32.mrb[12].mxu0 }
 0x7b4   : > { %v3818_v58 = vadd.f32 %v4451_v49, %v2192_v21  ;;  %v2194_v1 = vpop.f32.mrb[13].mxu0  ;;  %v3187_v40 = vpop.f32.mrb[22].mxu1 }
 0x7b5   : > { %v2269_v28 = vpop.f32.mrb[23].mxu1  ;;  %v3820_v62 = vadd.f32 %v4454_v3, %v2194_v1  ;;  %v2275_v57 = vadd.f32 %v3187_v40, %v4461_v37 }
 0x7b6   : > { %v2687_v61 = vmul.f32 -1.442695, %v3818_v58  ;;  %v2270_v29 = vadd.f32 %v2269_v28, %v4461_v37 }
 0x7b7   : > { %v2198_v38 = vpop.f32.mrb[14].mxu0  ;;  %v2688_v31 = vmul.f32 -1.442695, %v3820_v62 }
 0x7b8   : > { %3969 = vpow2.f32 %v2687_v61  ;;  %v3822_v42 = vadd.f32 %v4451_v49, %v2198_v38  ;;  %v2200_v13 = vpop.f32.mrb[15].mxu0  ;;  %v2069_v49 = vadd.f32 %v4627_v19, %v4459_v34 }
 0x7b9   : > { %v3824_v56 = vadd.f32 %v4454_v3, %v2200_v13  ;;  %v2074_v3 = vadd.f32 %v4625_v12, %v4459_v34 }
 0x7ba   : > { %v2689_v47 = vmul.f32 -1.442695, %v3822_v42 }
 0x7bb   : > { %v2690_v4 = vmul.f32 -1.442695, %v3824_v56 }
 0x7bc   : > { %3971 = vpow2.f32 %v2689_v47 }
 0x7bd   : > { %3973 = vpow2.f32 %v2688_v31 }
 0x7c2   : > { %v3970_v7 = vpop.eup %3969 }
 0x7c3   : > { %v2294_v60 = vadd.f32 1.0, %v3970_v7 }
 0x7c5   : > { %3975 = vrcp.f32 %v2294_v60 }
 0x7c6   : > { %v3972_v14 = vpop.eup %3971  ;;  %3977 = vpow2.f32 %v2690_v4 }
 0x7c7   : > { %v2296_v17 = vadd.f32 1.0, %v3972_v14  ;;  %v3974_v26 = vpop.eup %3973 }
 0x7c8   : > { %v2295_v45 = vadd.f32 1.0, %v3974_v26 }
 0x7c9   : > { %3979 = vrcp.f32 %v2296_v17 }
 0x7cf   : > { %v3976_v18 = vpop.eup %3975 }
 0x7d0   : > { %v2306_v36 = vmul.f32 %v3976_v18, %v2069_v49  ;;  %v3978_v39 = vpop.eup %3977 }
 0x7d1   : > { %v2297_v11 = vadd.f32 1.0, %v3978_v39 }
 0x7d2   : > { %v2308_v43 = vadd.f32 %v2306_v36, %v2270_v29 }
 0x7d3   : > { %v3980_v48 = vpop.eup %3979 }
 0x7d4   : > { %v2307_v63 = vmul.f32 %v3980_v48, %v2074_v3  ;;  %3981 = vtanh.f32 %v2308_v43 }
 0x7d5   : > { %3983 = vrcp.f32 %v2295_v45 }
 0x7d6   : > { %v2309_v5 = vadd.f32 %v2307_v63, %v2275_v57 }
 0x7d8   : > { %3985 = vtanh.f32 %v2309_v5 }
 0x7d9   : > { %3987 = vrcp.f32 %v2297_v11 }
 0x7de   : > { %v3982_v19 = vpop.eup %3981 }
 0x7df   : > { %v2312_v9 = vsub.f32 %v4593_v8, %v3982_v19  ;;  %v3984_v27 = vpop.eup %3983  ;;  %v2335_v8 = vstv %s2334_s24 }
 0x7e1   : > { %v2314_v10 = vmul.f32 %v3984_v27, %v2312_v9 }
 0x7e2   : > { %v3986_v30 = vpop.eup %3985 }
 0x7e3   : > { %v2313_v34 = vsub.f32 %v4598_v54, %v3986_v30  ;;  %v2316_v12 = vadd.f32 %v3982_v19, %v2314_v10  ;;  %v3988_v16 = vpop.eup %3987 }
 0x7e5   : > { %v2315_v59 = vmul.f32 %v3988_v16, %v2313_v34  ;;  %3220 = vmatprep.mubr.f32.mxu0 %v2316_v12 }
 0x7e7   : > { %v2317_v37 = vadd.f32 %v3986_v30, %v2315_v59 }
 0x7e9   : > { %v3791_v20 = vpack.c.bf16 %v2317_v37, %v2316_v12  ;;  %3221 = vmatmul.mubr.f32.vlgmr.msra.gmra.mrb[16].mxu0 %v2317_v37 }
 0x7eb   : > { %3792 = vmatpush3.bf16.msra.mxu1 %v3791_v20 }
 0x8bc   : > { %v3222_v23 = vpop.f32.mrb[16].mxu0 }
 0x8bd   : > { %v2408_v24 = vadd.f32 %v3222_v23, %v2335_v8  ;;  %v2402_v25 = vpop.f32.mrb[17].mxu0 }
 0x8be   : > { %v2403_v0 = vadd.f32 %v2402_v25, %v2335_v8 }
 0x8bf   : > { %v2692_v54 = vmul.f32 -1.442695, %v2408_v24 }
 0x8c0   : > { %v2691_v41 = vmul.f32 -1.442695, %v2403_v0 }
 0x8c1   : > { %3989 = vpow2.f32 %v2692_v54 }
 0x8c2   : > { %3991 = vpow2.f32 %v2691_v41 }
 0x8cb   : > { %v3990_v44 = vpop.eup %3989 }
 0x8cc   : > { %v3992_v2 = vpop.eup %3991  ;;  %v2418_v6 = vadd.f32 1.0, %v3990_v44 }
 0x8cd   : > { %v2417_v50 = vadd.f32 1.0, %v3992_v2 }
 0x8ce   : > { %3993 = vrcp.f32 %v2418_v6 }
 0x8cf   : > { %3995 = vrcp.f32 %v2417_v50 }
 0x8d8   : > { %v3994_v46 = vpop.eup %3993 }
 0x8d9   : > { %v3996_v15 = vpop.eup %3995  ;;  %v2425_v35 = vmul.f32 1.442695, %v3994_v46 }
 0x8da   : > { %v2423_v33 = vmul.f32 1.442695, %v3996_v15 }
 0x8db   : > { %3997 = vpow2.f32 %v2425_v35 }
 0x8dc   : > { %3999 = vpow2.f32 %v2423_v33 }
 0x8e5   : > { %v3998_v32 = vpop.eup %3997 }
 0x8e6   : > { %v4000_v51 = vpop.eup %3999  ;;  %v2429_v52 = vsel %vm2427_vm2, %v3998_v32, 0.0 }
 0x8e7   : > { %2441 = vxpose.xlu0.b32.start [1/2] (short) (narrow) %v4000_v51, 8  ;;  %v2428_v53 = vsel %vm2427_vm2, %v4000_v51, 0.0 }
 0x8e8   : > { %v2430_v55 = vadd.f32 %v2429_v52, %v2428_v53 }
 0x8ea   : > { %v2431_v21 = vrot.slane %v2430_v55, 4 }
 0x8eb   : > { %2442 = vxpose.xlu0.b32.end [2/2] (short) (narrow) %v3998_v32, 8 }
 0x8ec   : > { %v2432_v58 = vadd.f32 %v2431_v21, %v2430_v55 }
 0x8ee   : > { %v2433_v1 = vrot.slane %v2432_v58, 2 }
 0x8f0   : > { %v2434_v40 = vadd.f32 %v2433_v1, %v2432_v58 }
 0x8f2   : > { %v2435_v28 = vrot.slane %v2434_v40, 1 }
 0x8f4   : > { %v2436_v61 = vadd.f32 %v2435_v28, %v2434_v40 }
 0x8f6   : > { %4001 = vrcp.f32 %v2436_v61 }
 0x900   : > { %v4002_v38 = vpop.eup %4001 }
 0x901   : > { %v2438_v42 = vmul.f32 %v4002_v38, %v2436_v61 }
 0x903   : > { %v2439_v13 = vsub.f32 2.0, %v2438_v42 }
 0x905   : > { %v2440_v47 = vmul.f32 %v4002_v38, %v2439_v13 }
 0x907   : > { %2548 = vperm.xlu1 %3907, %v2440_v47  }
 0x914   : > { %3908 = vset.pattern.permute.xlu0 %v4139_v22 }
 0x967   : > { %v2457_v62 = vpop.trf.xlu0 }
 0x968   : > { %3228 = vmatmul.mubr.msk.f32.vlgmr.msra.gmra.mrb[24].mxu1 %vm440_vm0, %v2457_v62 }
 0x986   : > { %v2549_v31 = vpop.permute.xlu1 %2548 }
 0xa3b   : > { %v2542_v56 = vpop.f32.mrb[24].mxu1 }
 0xa3c   : > { %v2551_v7 = vmul.f32 %v2549_v31, %v2542_v56  ;;  %v3229_v60 = vpop.f32.mrb[25].mxu1 }
 0xa3e   : > { %2552 = vst [vmem:[%s343_s19] sm:$0x1] %v2551_v7 }
 0xa3f   : > { %4074 = shalt.err (!%p4071_p11)
}
 0xa40   : > { %s4075_s14 = scalar_lea.hbm %s4696_s26, 16  ;;  %s4079_s24 = scalar_lea.hbm %s4746_s8, 64 }
 0xa41   : > { %p4076_p13 = scmp.ne.s32.totalorder %s4696_s26, %s4075_s14  ;;  %p4080_p6 = scmp.lt.u32.totalorder %s4696_s26, %s4746_s8 }
 0xa42   : > { %p4081_p9 = scmp.lt.u32.totalorder %s4079_s24, %s4075_s14  ;;  %p4083_p12 = scmp.lt.u32.totalorder %s4075_s14, %s4696_s26 }
 0xa43   : > { %p4077_p5 = pnand %p4076_p13, %p4760_p1 }
 0xa44   : > { %p4082_p10 = por %p4081_p9, %p4080_p6 }
 0xa45   : > { %p4078_p0 = pneg %p4077_p5 }
 0xa46   : > { %p4084_p2 = por %p4083_p12, %p4082_p10 }
 0xa48   : > { %p4085_p3 = pnand %p4084_p2, %p4078_p0 }
 0xa4a   : > { %4088 = shalt.err (!%p4085_p3)
}
 0xa4b   : > { %3849 = dma.vmem_to_hbm [thread:$0]  (%p4760_p1), %s4698_s18, 16, %s4696_s26, %s2554_s27  }
 0xa4c PF: > { %p3866_p4 = scmp.ge.s32.totalorder %s4131_s10, 2  ;;  %s2578_s19 = sand.u32 1, %s4119_s29  }
 0xa4d   : > { %p4761_p7 = scmp.ne.s32.totalorder %s4752_s17, 0  ;;  %s2579_s22 = scalar_lea.sflag [#allocation5], %s2578_s19 }
 0xa4f   : > { %p3859_p8 = pnand %p3866_p4, %p4761_p7 }
 0xa51   : > { %4114 = dma.done.wait (!%p3859_p8), %s2579_s22, 16  }
 0xa52   : > { %4116 = vsyncadd (!%p3859_p8), %s2579_s22, 4294967280  ;;  %s4762_s25 = sld [smem:[#allocation12_spill]]  ;;  %p21_p11 = scmp.ge.s32.totalorder %s4215_s12, 6  }
 0xa53   : > { %s4763_s29 = smov %s4123_s30  ;;  %s4764_s30 = smov %s4127_s9 }
 0xa54   : > { %s4766_s10 = smov %s4215_s12  ;;  %23 = sbr.rel (!%p21_p11) target bundleno = 7 (0x7), region = 102 }
 0xa58   : > { %s4765_s9 = smov %s4762_s25 }
 0xa5b   :  { %2583 = vsyncpa [#allocation4], 1 }
 0xa5c   :  { %2585 = vsyncpa [#allocation4 + $0x1], 1 }
 0xa5d   :  { %2586 = vsyncpa [#allocation7], 1 }
 0xa5e   :  { %2587 = vsyncpa [#allocation5], 1 }
 0xa5f   :  { %2589 = vsyncpa [#allocation5 + $0x1], 1 }

</bundles_post_ra>
